<compile_context>
chip_gen: v7x
topology: tpu7x:2x2x1
jax: 0.10.0
libtpu: 0.0.40
codegen_flags: <defaults>
</compile_context>

<pallas_src>
import functools

import jax
import jax.numpy as jnp
from jax import lax
from jax.experimental import pallas as pl
from jax.experimental.pallas import tpu as pltpu

K = 8              # self.k in the module
ROW_STRIP = 32     # rows per top-k sub-block (multiple of 8)


def _vmem_limit_bytes():
    """Generation-aware scoped-VMEM budget with headroom for Mosaic scratch."""
    cap = 64 * 1024 * 1024                      # conservative fallback (v7x physical)
    try:
        info = pltpu.get_tpu_info()
        cap = int(getattr(info, "vmem_capacity_bytes", cap))
    except Exception:
        pass
    return min((cap * 3) // 4, 96 * 1024 * 1024)


def sae_forward_kernel(x_ref, xmean_ref, bdec_ref, wenc_ref, wdec_ref,
                       xrec_ref, part_ref, pre_ref, z_ref, *, row_strip):
    x = x_ref[...]                              # [TB, D] f32
    b_dec = bdec_ref[...]                       # [1, D]  f32

    # Encoder: sae_in = x - b_dec (encoder bias is zeroed in __init__);
    # pre_acts = relu(sae_in @ W_enc^T).  Full-tile matmul (MXU M = TB).
    sae_in = (x - b_dec).astype(jnp.bfloat16)
    pre_ref[...] = jnp.maximum(
        jnp.dot(sae_in, wenc_ref[...], preferred_element_type=jnp.float32), 0.0)

    # TODO(synk): the corr_file dampen_neurons branch (host-loaded correlation
    # indices scaling pre_acts) is host/IO state outside this kernel.

    # Top-k (k=8) per row, processed in row_strip-row strips so the live
    # temporaries of the K masked row-max passes stay a few vregs (no spills).
    # For ReLU'd continuous activations the threshold select matches
    # torch.topk + scatter_ (exact ties at the threshold have ~zero
    # probability; extra kept zeros contribute nothing to x_rec).
    n_strips = x_ref.shape[0] // row_strip

    def strip_body(s, carry):
        off = pl.multiple_of(s * row_strip, row_strip)
        strip = pre_ref[pl.ds(off, row_strip), :]        # [rs, H] f32
        work = strip
        kth = None
        for _ in range(K):                               # small fixed k, unrolled
            kth = jnp.max(work, axis=-1, keepdims=True)  # [rs, 1]
            work = jnp.where(work >= kth, -jnp.inf, work)
        # threshold select, cast straight to bf16 for the decoder matmul
        z_ref[pl.ds(off, row_strip), :] = jnp.where(
            strip >= kth, strip, 0.0).astype(z_ref.dtype)
        return carry

    lax.fori_loop(0, n_strips, strip_body, 0, unroll=True)

    # Decoder: x_reconstructed = z @ W_dec + b_dec (full-tile bf16 matmul).
    x_rec = jnp.dot(z_ref[...], wdec_ref[...],
                    preferred_element_type=jnp.float32) + b_dec
    xrec_ref[...] = x_rec.astype(xrec_ref.dtype)

    # FVU partials, merged into one lane-dense block per tile:
    #   row 0: per-feature sum(e^2); row 1: per-feature sum((x - mean_B x)^2).
    e = x_rec - x
    dx = x - xmean_ref[...]
    err_row = jnp.sum(e * e, axis=0, keepdims=True)      # [1, D]
    var_row = jnp.sum(dx * dx, axis=0, keepdims=True)    # [1, D]
    part_ref[...] = jnp.concatenate([err_row, var_row], axis=0)[None]


def _vmem_bytes_estimate(tile_b, d_in, hidden):
    """Rough double-buffered footprint used to sanity-check the tile choice."""
    f32, bf16 = 4, 2
    d_pad = max(d_in, 128)
    n = 0
    n += 2 * tile_b * d_in * f32        # x tile (double-buffered input)
    n += 2 * tile_b * d_in * f32        # x_rec tile (double-buffered output)
    n += 2 * d_in * hidden * bf16       # W_enc^T (2 pipeline buffers)
    n += 2 * hidden * d_in * bf16       # W_dec   (2 pipeline buffers)
    n += 12 * 8 * d_pad * f32           # x_mean / b_dec / partials blocks (padded)
    n += tile_b * hidden * f32          # pre scratch
    n += tile_b * hidden * bf16         # z scratch
    return n


def sae_forward(x, b_dec, w_enc, w_dec, *, tile_b=256):
    B, D = x.shape
    H = w_enc.shape[0]
    tile_b = min(tile_b, B)
    assert B % tile_b == 0 and tile_b % 8 == 0, (
        "batch size must be a multiple of tile_b (tile_b a multiple of 8)")
    row_strip = min(ROW_STRIP, tile_b)
    assert tile_b % row_strip == 0, "tile_b must be a multiple of the row strip"
    num_tiles = B // tile_b

    vmem_limit = _vmem_limit_bytes()
    assert _vmem_bytes_estimate(tile_b, D, H) <= vmem_limit, (
        "tile_b too large for the VMEM budget; lower tile_b")

    x = x.astype(jnp.float32)
    x_mean = jnp.mean(x, axis=0, keepdims=True)        # global batch mean for FVU
    b_dec2 = jnp.reshape(b_dec, (1, D)).astype(jnp.float32)
    w_enc_t = w_enc.T.astype(jnp.bfloat16)             # [D, H], pre-transposed
    w_dec_b = w_dec.astype(jnp.bfloat16)               # [H, D]

    # TODO(synk): weights are kept with the default double-buffered BlockSpec
    # (constant index_map => no re-DMA); at very large D*H single-buffer them
    # to halve the resident footprint on v7x's 64 MiB VMEM.
    kernel = functools.partial(sae_forward_kernel, row_strip=row_strip)

    out_shapes = (
        jax.ShapeDtypeStruct((B, D), jnp.float32),             # x_reconstructed
        jax.ShapeDtypeStruct((num_tiles, 2, D), jnp.float32),  # FVU partials
    )
    x_rec, parts = pl.pallas_call(
        kernel,
        out_shape=out_shapes,
        grid=(num_tiles,),
        in_specs=[
            pl.BlockSpec((tile_b, D), lambda i: (i, 0)),   # x: batch-tiled
            pl.BlockSpec((1, D), lambda i: (0, 0)),        # x_mean: resident
            pl.BlockSpec((1, D), lambda i: (0, 0)),        # b_dec: resident
            pl.BlockSpec((D, H), lambda i: (0, 0)),        # W_enc^T: resident
            pl.BlockSpec((H, D), lambda i: (0, 0)),        # W_dec: resident
        ],
        out_specs=(
            pl.BlockSpec((tile_b, D), lambda i: (i, 0)),
            pl.BlockSpec((1, 2, D), lambda i: (i, 0, 0)),
        ),
        scratch_shapes=[
            pltpu.VMEM((tile_b, H), jnp.float32),   # pre-activations
            pltpu.VMEM((tile_b, H), jnp.bfloat16),  # sparse activations z
        ],
        compiler_params=pltpu.CompilerParams(
            dimension_semantics=("parallel",),
            vmem_limit_bytes=vmem_limit,
        ),
    )(x, x_mean, b_dec2, w_enc_t, w_dec_b)

    # fvu = sum(e^2) / sum((x - mean_B(x))^2)   (matches the module: no eps)
    fvu = jnp.sum(parts[:, 0, :]) / jnp.sum(parts[:, 1, :])
    return x_rec, fvu


def reference_forward(x, b_dec, w_enc, w_dec):
    """Pure-JAX reference with the same precision policy (bf16 matmul operands,
    f32 accumulation, f32 FVU) but exact lax.top_k + scatter sparsification."""
    sae_in = (x - b_dec).astype(jnp.bfloat16)
    pre = jnp.maximum(
        jnp.dot(sae_in, w_enc.T.astype(jnp.bfloat16),
                preferred_element_type=jnp.float32), 0.0)
    vals, idxs = jax.lax.top_k(pre, K)
    hidden = pre.shape[-1]
    z = jax.vmap(
        lambda ir, vr: jnp.zeros((hidden,), jnp.float32).at[ir].set(vr)
    )(idxs, vals)
    x_rec = jnp.dot(z.astype(jnp.bfloat16), w_dec.astype(jnp.bfloat16),
                    preferred_element_type=jnp.float32) + b_dec
    e = x_rec - x
    tv = jnp.sum((x - x.mean(0)) ** 2)
    fvu = jnp.sum(e ** 2) / tv
    return x_rec, fvu


if __name__ == "__main__":
    # d_in = recommender hidden size; hidden_dim = d_in * sae_scale_size.
    # B=256 with tile_b=64 -> 4 grid steps: the BlockSpec pipeline has tiles to
    # prefetch and v7x megacore gets >= 2 steps per TensorCore.
    B = 256
    d_in = 128
    scale_size = 4
    hidden_dim = d_in * scale_size      # 512

    key = jax.random.PRNGKey(0)
    kx, kw = jax.random.split(key)
    x = jax.random.normal(kx, (B, d_in), dtype=jnp.float32)

    # Deterministic parameter init mirroring __init__:
    #   encoder = nn.Linear(d_in, hidden_dim) -> weight [hidden_dim, d_in],
    #   encoder.bias zeroed; W_dec = encoder.weight.clone(), row-normalized;
    #   b_dec = zeros(d_in).
    w_enc = (jax.random.uniform(kw, (hidden_dim, d_in), dtype=jnp.float32) - 0.5) \
        * (2.0 / jnp.sqrt(jnp.float32(d_in)))
    eps = jnp.finfo(jnp.float32).eps
    w_dec = w_enc / (jnp.linalg.norm(w_enc, axis=1, keepdims=True) + eps)
    b_dec = jnp.zeros((d_in,), dtype=jnp.float32)

    x_rec, fvu = sae_forward(x, b_dec, w_enc, w_dec, tile_b=64)
    jax.block_until_ready(x_rec)
    jax.block_until_ready(fvu)

    x_rec_ref, fvu_ref = reference_forward(x, b_dec, w_enc, w_dec)
    assert jnp.allclose(x_rec, x_rec_ref, atol=2e-3, rtol=2e-3), "x_rec mismatch"
    assert jnp.allclose(fvu, fvu_ref, atol=2e-3, rtol=2e-3), "fvu mismatch"

    # TODO(synk): host-side bookkeeping (activate_latents set, epoch_activations
    # numpy concat, highest_activations dict), the corr_file dampen_neurons
    # branch, and the train-mode aux-k loss (depends on previous-epoch dead
    # latents) are Python/host state outside the forward compute.
    print("KERNEL_OK")
</pallas_src>

<mosaic_0001>
module attributes {stable_mosaic.version = 11 : i64} {
  func.func @sae_forward_kernel(%arg0: i32, %arg1: memref<64x128xf32, #tpu.memory_space<vmem>>, %arg2: memref<1x128xf32, #tpu.memory_space<vmem>>, %arg3: memref<1x128xf32, #tpu.memory_space<vmem>>, %arg4: memref<128x512xbf16, #tpu.memory_space<vmem>>, %arg5: memref<512x128xbf16, #tpu.memory_space<vmem>>, %arg6: memref<64x128xf32, #tpu.memory_space<vmem>>, %arg7: memref<1x2x128xf32, #tpu.memory_space<vmem>>, %arg8: memref<64x512xf32, #tpu.memory_space<vmem>>, %arg9: memref<64x512xbf16, #tpu.memory_space<vmem>>) attributes {dimension_semantics = [#tpu.dimension_semantics<parallel>], iteration_bounds = array<i64: 4>, scalar_prefetch = 0 : i64, scratch_operands = 2 : i64, tpu.core_type = #tpu.core_type<tc>, window_params = [{transform_indices = @transform_0, window_bounds = array<i64: 64, 128>}, {pipeline_mode = #tpu.pipeline_mode<synchronous>, transform_indices = @transform_1, window_bounds = array<i64: 1, 128>}, {pipeline_mode = #tpu.pipeline_mode<synchronous>, transform_indices = @transform_2, window_bounds = array<i64: 1, 128>}, {pipeline_mode = #tpu.pipeline_mode<synchronous>, transform_indices = @transform_3, window_bounds = array<i64: 128, 512>}, {pipeline_mode = #tpu.pipeline_mode<synchronous>, transform_indices = @transform_4, window_bounds = array<i64: 512, 128>}, {transform_indices = @transform_5, window_bounds = array<i64: 64, 128>}, {transform_indices = @transform_6, window_bounds = array<i64: 1, 2, 128>}]} {
    %c0 = arith.constant 0 : index
    %c0_0 = arith.constant 0 : index
    %0 = vector.load %arg1[%c0, %c0_0] : memref<64x128xf32, #tpu.memory_space<vmem>>, vector<64x128xf32>
    %c0_1 = arith.constant 0 : index
    %c0_2 = arith.constant 0 : index
    %1 = vector.load %arg3[%c0_1, %c0_2] : memref<1x128xf32, #tpu.memory_space<vmem>>, vector<1x128xf32>
    %2 = vector.broadcast %1 : vector<1x128xf32> to vector<64x128xf32>
    %3 = arith.subf %0, %2 : vector<64x128xf32>
    %4 = arith.truncf %3 : vector<64x128xf32> to vector<64x128xbf16>
    %c0_3 = arith.constant 0 : index
    %c0_4 = arith.constant 0 : index
    %5 = vector.load %arg4[%c0_3, %c0_4] : memref<128x512xbf16, #tpu.memory_space<vmem>>, vector<128x512xbf16>
    %cst = arith.constant dense<0.000000e+00> : vector<64x512xf32>
    %6 = tpu.matmul %4, %5, %cst {dimension_numbers = #tpu.dot_dimension_numbers<[1], [0], [0], [1], [0, 0, 1, 1], [], []>} : vector<64x128xbf16>, vector<128x512xbf16>, vector<64x512xf32> -> vector<64x512xf32>
    %cst_5 = arith.constant 0.000000e+00 : f32
    %7 = vector.broadcast %cst_5 : f32 to vector<64x512xf32>
    %8 = arith.maximumf %6, %7 : vector<64x512xf32>
    %c0_6 = arith.constant 0 : index
    %c0_7 = arith.constant 0 : index
    %9 = vector.load %arg8[%c0_6, %c0_7] : memref<64x512xf32, #tpu.memory_space<vmem>>, vector<64x512xf32>
    tpu.vector_store %arg8[%c0_6, %c0_7], %8 {strides = array<i32>} : memref<64x512xf32, #tpu.memory_space<vmem>>, vector<64x512xf32>,
    %c0_i32 = arith.constant 0 : i32
    %c32_i32 = arith.constant 32 : i32
    %10 = arith.muli %c0_i32, %c32_i32 : i32
    %11 = tpu.assume_multiple %10, 32 : i32
    %12 = arith.index_cast %11 : i32 to index
    %c0_8 = arith.constant 0 : index
    %13 = vector.load %arg8[%12, %c0_8] : memref<64x512xf32, #tpu.memory_space<vmem>>, vector<32x512xf32>
    %cst_9 = arith.constant dense<0xFF800000> : vector<32xf32>
    %14 = vector.multi_reduction <maximumf>, %13, %cst_9 [1] : vector<32x512xf32> to vector<32xf32>
    %15 = vector.shape_cast %14 : vector<32xf32> to vector<32x1xf32>
    %16 = vector.broadcast %15 : vector<32x1xf32> to vector<32x512xf32>
    %17 = arith.cmpf oge, %13, %16 : vector<32x512xf32>
    %cst_10 = arith.constant 0xFF800000 : f32
    %18 = vector.broadcast %cst_10 : f32 to vector<32x512xf32>
    %19 = arith.select %17, %18, %13 : vector<32x512xi1>, vector<32x512xf32>
    %cst_11 = arith.constant dense<0xFF800000> : vector<32xf32>
    %20 = vector.multi_reduction <maximumf>, %19, %cst_11 [1] : vector<32x512xf32> to vector<32xf32>
    %21 = vector.shape_cast %20 : vector<32xf32> to vector<32x1xf32>
    %22 = vector.broadcast %21 : vector<32x1xf32> to vector<32x512xf32>
    %23 = arith.cmpf oge, %19, %22 : vector<32x512xf32>
    %cst_12 = arith.constant 0xFF800000 : f32
    %24 = vector.broadcast %cst_12 : f32 to vector<32x512xf32>
    %25 = arith.select %23, %24, %19 : vector<32x512xi1>, vector<32x512xf32>
    %cst_13 = arith.constant dense<0xFF800000> : vector<32xf32>
    %26 = vector.multi_reduction <maximumf>, %25, %cst_13 [1] : vector<32x512xf32> to vector<32xf32>
    %27 = vector.shape_cast %26 : vector<32xf32> to vector<32x1xf32>
    %28 = vector.broadcast %27 : vector<32x1xf32> to vector<32x512xf32>
    %29 = arith.cmpf oge, %25, %28 : vector<32x512xf32>
    %cst_14 = arith.constant 0xFF800000 : f32
    %30 = vector.broadcast %cst_14 : f32 to vector<32x512xf32>
    %31 = arith.select %29, %30, %25 : vector<32x512xi1>, vector<32x512xf32>
    %cst_15 = arith.constant dense<0xFF800000> : vector<32xf32>
    %32 = vector.multi_reduction <maximumf>, %31, %cst_15 [1] : vector<32x512xf32> to vector<32xf32>
    %33 = vector.shape_cast %32 : vector<32xf32> to vector<32x1xf32>
    %34 = vector.broadcast %33 : vector<32x1xf32> to vector<32x512xf32>
    %35 = arith.cmpf oge, %31, %34 : vector<32x512xf32>
    %cst_16 = arith.constant 0xFF800000 : f32
    %36 = vector.broadcast %cst_16 : f32 to vector<32x512xf32>
    %37 = arith.select %35, %36, %31 : vector<32x512xi1>, vector<32x512xf32>
    %cst_17 = arith.constant dense<0xFF800000> : vector<32xf32>
    %38 = vector.multi_reduction <maximumf>, %37, %cst_17 [1] : vector<32x512xf32> to vector<32xf32>
    %39 = vector.shape_cast %38 : vector<32xf32> to vector<32x1xf32>
    %40 = vector.broadcast %39 : vector<32x1xf32> to vector<32x512xf32>
    %41 = arith.cmpf oge, %37, %40 : vector<32x512xf32>
    %cst_18 = arith.constant 0xFF800000 : f32
    %42 = vector.broadcast %cst_18 : f32 to vector<32x512xf32>
    %43 = arith.select %41, %42, %37 : vector<32x512xi1>, vector<32x512xf32>
    %cst_19 = arith.constant dense<0xFF800000> : vector<32xf32>
    %44 = vector.multi_reduction <maximumf>, %43, %cst_19 [1] : vector<32x512xf32> to vector<32xf32>
    %45 = vector.shape_cast %44 : vector<32xf32> to vector<32x1xf32>
    %46 = vector.broadcast %45 : vector<32x1xf32> to vector<32x512xf32>
    %47 = arith.cmpf oge, %43, %46 : vector<32x512xf32>
    %cst_20 = arith.constant 0xFF800000 : f32
    %48 = vector.broadcast %cst_20 : f32 to vector<32x512xf32>
    %49 = arith.select %47, %48, %43 : vector<32x512xi1>, vector<32x512xf32>
    %cst_21 = arith.constant dense<0xFF800000> : vector<32xf32>
    %50 = vector.multi_reduction <maximumf>, %49, %cst_21 [1] : vector<32x512xf32> to vector<32xf32>
    %51 = vector.shape_cast %50 : vector<32xf32> to vector<32x1xf32>
    %52 = vector.broadcast %51 : vector<32x1xf32> to vector<32x512xf32>
    %53 = arith.cmpf oge, %49, %52 : vector<32x512xf32>
    %cst_22 = arith.constant 0xFF800000 : f32
    %54 = vector.broadcast %cst_22 : f32 to vector<32x512xf32>
    %55 = arith.select %53, %54, %49 : vector<32x512xi1>, vector<32x512xf32>
    %cst_23 = arith.constant dense<0xFF800000> : vector<32xf32>
    %56 = vector.multi_reduction <maximumf>, %55, %cst_23 [1] : vector<32x512xf32> to vector<32xf32>
    %57 = vector.shape_cast %56 : vector<32xf32> to vector<32x1xf32>
    %58 = vector.broadcast %57 : vector<32x1xf32> to vector<32x512xf32>
    %59 = arith.cmpf oge, %13, %58 : vector<32x512xf32>
    %cst_24 = arith.constant 0.000000e+00 : f32
    %60 = vector.broadcast %cst_24 : f32 to vector<32x512xf32>
    %61 = arith.select %59, %13, %60 : vector<32x512xi1>, vector<32x512xf32>
    %62 = arith.truncf %61 : vector<32x512xf32> to vector<32x512xbf16>
    %63 = arith.index_cast %11 : i32 to index
    %c0_25 = arith.constant 0 : index
    %64 = vector.load %arg9[%63, %c0_25] : memref<64x512xbf16, #tpu.memory_space<vmem>>, vector<32x512xbf16>
    tpu.vector_store %arg9[%63, %c0_25], %62 {strides = array<i32>} : memref<64x512xbf16, #tpu.memory_space<vmem>>, vector<32x512xbf16>,
    %c1_i32 = arith.constant 1 : i32
    %c32_i32_26 = arith.constant 32 : i32
    %65 = arith.muli %c1_i32, %c32_i32_26 : i32
    %66 = tpu.assume_multiple %65, 32 : i32
    %67 = arith.index_cast %66 : i32 to index
    %c0_27 = arith.constant 0 : index
    %68 = vector.load %arg8[%67, %c0_27] : memref<64x512xf32, #tpu.memory_space<vmem>>, vector<32x512xf32>
    %cst_28 = arith.constant dense<0xFF800000> : vector<32xf32>
    %69 = vector.multi_reduction <maximumf>, %68, %cst_28 [1] : vector<32x512xf32> to vector<32xf32>
    %70 = vector.shape_cast %69 : vector<32xf32> to vector<32x1xf32>
    %71 = vector.broadcast %70 : vector<32x1xf32> to vector<32x512xf32>
    %72 = arith.cmpf oge, %68, %71 : vector<32x512xf32>
    %cst_29 = arith.constant 0xFF800000 : f32
    %73 = vector.broadcast %cst_29 : f32 to vector<32x512xf32>
    %74 = arith.select %72, %73, %68 : vector<32x512xi1>, vector<32x512xf32>
    %cst_30 = arith.constant dense<0xFF800000> : vector<32xf32>
    %75 = vector.multi_reduction <maximumf>, %74, %cst_30 [1] : vector<32x512xf32> to vector<32xf32>
    %76 = vector.shape_cast %75 : vector<32xf32> to vector<32x1xf32>
    %77 = vector.broadcast %76 : vector<32x1xf32> to vector<32x512xf32>
    %78 = arith.cmpf oge, %74, %77 : vector<32x512xf32>
    %cst_31 = arith.constant 0xFF800000 : f32
    %79 = vector.broadcast %cst_31 : f32 to vector<32x512xf32>
    %80 = arith.select %78, %79, %74 : vector<32x512xi1>, vector<32x512xf32>
    %cst_32 = arith.constant dense<0xFF800000> : vector<32xf32>
    %81 = vector.multi_reduction <maximumf>, %80, %cst_32 [1] : vector<32x512xf32> to vector<32xf32>
    %82 = vector.shape_cast %81 : vector<32xf32> to vector<32x1xf32>
    %83 = vector.broadcast %82 : vector<32x1xf32> to vector<32x512xf32>
    %84 = arith.cmpf oge, %80, %83 : vector<32x512xf32>
    %cst_33 = arith.constant 0xFF800000 : f32
    %85 = vector.broadcast %cst_33 : f32 to vector<32x512xf32>
    %86 = arith.select %84, %85, %80 : vector<32x512xi1>, vector<32x512xf32>
    %cst_34 = arith.constant dense<0xFF800000> : vector<32xf32>
    %87 = vector.multi_reduction <maximumf>, %86, %cst_34 [1] : vector<32x512xf32> to vector<32xf32>
    %88 = vector.shape_cast %87 : vector<32xf32> to vector<32x1xf32>
    %89 = vector.broadcast %88 : vector<32x1xf32> to vector<32x512xf32>
    %90 = arith.cmpf oge, %86, %89 : vector<32x512xf32>
    %cst_35 = arith.constant 0xFF800000 : f32
    %91 = vector.broadcast %cst_35 : f32 to vector<32x512xf32>
    %92 = arith.select %90, %91, %86 : vector<32x512xi1>, vector<32x512xf32>
    %cst_36 = arith.constant dense<0xFF800000> : vector<32xf32>
    %93 = vector.multi_reduction <maximumf>, %92, %cst_36 [1] : vector<32x512xf32> to vector<32xf32>
    %94 = vector.shape_cast %93 : vector<32xf32> to vector<32x1xf32>
    %95 = vector.broadcast %94 : vector<32x1xf32> to vector<32x512xf32>
    %96 = arith.cmpf oge, %92, %95 : vector<32x512xf32>
    %cst_37 = arith.constant 0xFF800000 : f32
    %97 = vector.broadcast %cst_37 : f32 to vector<32x512xf32>
    %98 = arith.select %96, %97, %92 : vector<32x512xi1>, vector<32x512xf32>
    %cst_38 = arith.constant dense<0xFF800000> : vector<32xf32>
    %99 = vector.multi_reduction <maximumf>, %98, %cst_38 [1] : vector<32x512xf32> to vector<32xf32>
    %100 = vector.shape_cast %99 : vector<32xf32> to vector<32x1xf32>
    %101 = vector.broadcast %100 : vector<32x1xf32> to vector<32x512xf32>
    %102 = arith.cmpf oge, %98, %101 : vector<32x512xf32>
    %cst_39 = arith.constant 0xFF800000 : f32
    %103 = vector.broadcast %cst_39 : f32 to vector<32x512xf32>
    %104 = arith.select %102, %103, %98 : vector<32x512xi1>, vector<32x512xf32>
    %cst_40 = arith.constant dense<0xFF800000> : vector<32xf32>
    %105 = vector.multi_reduction <maximumf>, %104, %cst_40 [1] : vector<32x512xf32> to vector<32xf32>
    %106 = vector.shape_cast %105 : vector<32xf32> to vector<32x1xf32>
    %107 = vector.broadcast %106 : vector<32x1xf32> to vector<32x512xf32>
    %108 = arith.cmpf oge, %104, %107 : vector<32x512xf32>
    %cst_41 = arith.constant 0xFF800000 : f32
    %109 = vector.broadcast %cst_41 : f32 to vector<32x512xf32>
    %110 = arith.select %108, %109, %104 : vector<32x512xi1>, vector<32x512xf32>
    %cst_42 = arith.constant dense<0xFF800000> : vector<32xf32>
    %111 = vector.multi_reduction <maximumf>, %110, %cst_42 [1] : vector<32x512xf32> to vector<32xf32>
    %112 = vector.shape_cast %111 : vector<32xf32> to vector<32x1xf32>
    %113 = vector.broadcast %112 : vector<32x1xf32> to vector<32x512xf32>
    %114 = arith.cmpf oge, %68, %113 : vector<32x512xf32>
    %cst_43 = arith.constant 0.000000e+00 : f32
    %115 = vector.broadcast %cst_43 : f32 to vector<32x512xf32>
    %116 = arith.select %114, %68, %115 : vector<32x512xi1>, vector<32x512xf32>
    %117 = arith.truncf %116 : vector<32x512xf32> to vector<32x512xbf16>
    %118 = arith.index_cast %66 : i32 to index
    %c0_44 = arith.constant 0 : index
    %119 = vector.load %arg9[%118, %c0_44] : memref<64x512xbf16, #tpu.memory_space<vmem>>, vector<32x512xbf16>
    tpu.vector_store %arg9[%118, %c0_44], %117 {strides = array<i32>} : memref<64x512xbf16, #tpu.memory_space<vmem>>, vector<32x512xbf16>,
    %c2_i32 = arith.constant 2 : i32
    %c0_45 = arith.constant 0 : index
    %c0_46 = arith.constant 0 : index
    %120 = vector.load %arg9[%c0_45, %c0_46] : memref<64x512xbf16, #tpu.memory_space<vmem>>, vector<64x512xbf16>
    %c0_47 = arith.constant 0 : index
    %c0_48 = arith.constant 0 : index
    %121 = vector.load %arg5[%c0_47, %c0_48] : memref<512x128xbf16, #tpu.memory_space<vmem>>, vector<512x128xbf16>
    %cst_49 = arith.constant dense<0.000000e+00> : vector<64x128xf32>
    %122 = tpu.matmul %120, %121, %cst_49 {dimension_numbers = #tpu.dot_dimension_numbers<[1], [0], [0], [1], [0, 0, 1, 1], [], []>} : vector<64x512xbf16>, vector<512x128xbf16>, vector<64x128xf32> -> vector<64x128xf32>
    %123 = vector.broadcast %1 : vector<1x128xf32> to vector<64x128xf32>
    %124 = arith.addf %122, %123 : vector<64x128xf32>
    %c0_50 = arith.constant 0 : index
    %c0_51 = arith.constant 0 : index
    %125 = vector.load %arg6[%c0_50, %c0_51] : memref<64x128xf32, #tpu.memory_space<vmem>>, vector<64x128xf32>
    tpu.vector_store %arg6[%c0_50, %c0_51], %124 {strides = array<i32>} : memref<64x128xf32, #tpu.memory_space<vmem>>, vector<64x128xf32>,
    %126 = arith.subf %124, %0 : vector<64x128xf32>
    %c0_52 = arith.constant 0 : index
    %c0_53 = arith.constant 0 : index
    %127 = vector.load %arg2[%c0_52, %c0_53] : memref<1x128xf32, #tpu.memory_space<vmem>>, vector<1x128xf32>
    %128 = vector.broadcast %127 : vector<1x128xf32> to vector<64x128xf32>
    %129 = arith.subf %0, %128 : vector<64x128xf32>
    %130 = arith.mulf %126, %126 : vector<64x128xf32>
    %cst_54 = arith.constant dense<0.000000e+00> : vector<128xf32>
    %131 = vector.multi_reduction <add>, %130, %cst_54 [0] : vector<64x128xf32> to vector<128xf32>
    %132 = vector.shape_cast %131 : vector<128xf32> to vector<1x128xf32>
    %133 = arith.mulf %129, %129 : vector<64x128xf32>
    %cst_55 = arith.constant dense<0.000000e+00> : vector<128xf32>
    %134 = vector.multi_reduction <add>, %133, %cst_55 [0] : vector<64x128xf32> to vector<128xf32>
    %135 = vector.shape_cast %134 : vector<128xf32> to vector<1x128xf32>
    %136 = tpu.concatenate %132, %135 in 0 : vector<1x128xf32>, vector<1x128xf32> -> vector<2x128xf32>
    %137 = vector.shape_cast %136 : vector<2x128xf32> to vector<1x2x128xf32>
    %c0_56 = arith.constant 0 : index
    %c0_57 = arith.constant 0 : index
    %c0_58 = arith.constant 0 : index
    %138 = vector.load %arg7[%c0_56, %c0_57, %c0_58] : memref<1x2x128xf32, #tpu.memory_space<vmem>>, vector<1x2x128xf32>
    tpu.vector_store %arg7[%c0_56, %c0_57, %c0_58], %137 {strides = array<i32>} : memref<1x2x128xf32, #tpu.memory_space<vmem>>, vector<1x2x128xf32>,
    return
  }
  func.func @transform_0(%arg0: i32) -> (i32, i32) {
    %c0_i32 = arith.constant 0 : i32
    %c0_i32_0 = arith.constant 0 : i32
    return %arg0, %c0_i32 : i32, i32
  }
  func.func @transform_1(%arg0: i32) -> (i32, i32) {
    %c0_i32 = arith.constant 0 : i32
    %c0_i32_0 = arith.constant 0 : i32
    %c0_i32_1 = arith.constant 0 : i32
    return %c0_i32, %c0_i32_0 : i32, i32
  }
  func.func @transform_2(%arg0: i32) -> (i32, i32) {
    %c0_i32 = arith.constant 0 : i32
    %c0_i32_0 = arith.constant 0 : i32
    %c0_i32_1 = arith.constant 0 : i32
    return %c0_i32, %c0_i32_0 : i32, i32
  }
  func.func @transform_3(%arg0: i32) -> (i32, i32) {
    %c0_i32 = arith.constant 0 : i32
    %c0_i32_0 = arith.constant 0 : i32
    %c0_i32_1 = arith.constant 0 : i32
    return %c0_i32, %c0_i32_0 : i32, i32
  }
  func.func @transform_4(%arg0: i32) -> (i32, i32) {
    %c0_i32 = arith.constant 0 : i32
    %c0_i32_0 = arith.constant 0 : i32
    %c0_i32_1 = arith.constant 0 : i32
    return %c0_i32, %c0_i32_0 : i32, i32
  }
  func.func @transform_5(%arg0: i32) -> (i32, i32) {
    %c0_i32 = arith.constant 0 : i32
    %c0_i32_0 = arith.constant 0 : i32
    return %arg0, %c0_i32 : i32, i32
  }
  func.func @transform_6(%arg0: i32) -> (i32, i32, i32) {
    %c0_i32 = arith.constant 0 : i32
    %c0_i32_0 = arith.constant 0 : i32
    %c0_i32_1 = arith.constant 0 : i32
    return %arg0, %c0_i32, %c0_i32_0 : i32, i32, i32
  }
}

</mosaic_0001>

<bundles_post_ra>
// kernel: tpu_custom_call.1
= control target key start
LH: loop header
LB: loop body
LE: loop exit
PB: predicated region body
PF: predicated region fallthrough
CT: control target
= control target key end

     0   :  { %12 = vsyncpa [#allocation5], 0  ;;  %s4444_s0 = inlined_call_operand.hbm [shape: f32[256,128], index: 0, kind: input, shape index: {}]   ;;  %s4445_s1 = inlined_call_operand.vmem [shape: f32[1,128], index: 1, kind: input, shape index: {}]   ;;  %s4446_s2 = inlined_call_operand.vmem [shape: f32[1,128], index: 2, kind: input, shape index: {}]   ;;  %s4447_s3 = inlined_call_operand.hbm [shape: bf16[128,512], index: 3, kind: input, shape index: {}]   ;;  %s4448_s4 = inlined_call_operand.hbm [shape: bf16[512,128], index: 4, kind: input, shape index: {}]   ;;  %s4449_s5 = inlined_call_operand.hbm [shape: f32[256,128], index: 5, kind: output, shape index: {0}]   ;;  %s4450_s6 = inlined_call_operand.hbm [shape: f32[4,2,128], index: 6, kind: output, shape index: {1}]  }
   0x1   :  { %14 = vsyncpa [#allocation5 + $0x1], 0 }
   0x2   :  { %15 = vsyncpa [#allocation8], 0 }
   0x3   :  { %16 = vsyncpa [#allocation6], 0 }
   0x4   :  { %18 = vsyncpa [#allocation6 + $0x1], 0 }
   0x5   :  { %19 = vsyncpa [#allocation12], 0 }
   0x6   :  { %21 = vsyncpa [#allocation12 + $0x1], 0  ;;  %s2912_s21 = smov 0   ;;  %s2914_s22 = smov 0  }
   0x7   :  { %s2916_s23 = smov 0   ;;  %s2918_s24 = smov 0  }
   0x8 LB: > { %s2933_s25 = sadd.s32 4294967295, %s2861_s24   ;;  %s2286_s26 = sadd.s32 4294967294, %s2861_s24   ;;  %s2861_s24 = sphi %s2918_s24, %s4525_s24   ;;  %s2857_s23 = sphi %s2916_s23, %s4524_s23   ;;  %s2853_s22 = sphi %s2914_s22, %s4523_s22   ;;  %s2849_s21 = sphi %s2912_s21, %s4522_s21  }
   0x9   : > { %p47_p0 = scmp.ne.s32.totalorder %s2853_s22, %s2849_s21  ;;  %p4451_p1 = scmp.eq.s32.totalorder %s2933_s25, 0 }
   0xa   : > { %p161_p3 = scmp.eq.s32.totalorder %s2286_s26, 3  ;;  %p2287_p5 = scmp.ge.s32.totalorder %s2861_s24, 1 }
   0xb   : > { %p2942_p4 = por %p4451_p1, %p47_p0  ;;  %p194_p7 = scmp.lt.s32.totalorder %s2861_s24, 5 }
   0xc   : > { %p2947_p6 = por %p161_p3, %p47_p0  ;;  %s2863_s30 = smov [#allocation7]  }
   0xd   : > { %s4482_s27 = scalar_select %p2942_p4, 1, 0 }
   0xe   : > { %s4483_s28 = scalar_select %p2947_p6, 1, 0 }
   0xf   : > { %p2952_p8 = pnand %p2287_p5, %p194_p7  ;;  %s212_s7 = sshll.u32 %s2863_s30, 4  ;;  %s213_s7 = int_to_ptr.vmem [resolvable:$true] %s212_s7 }
  0x10   : > { %s2864_s9 = smov [#allocation9]   ;;  %s2673_s13 = scalar_lea.hbm %s4447_s3, 4096 }
  0x11   : > { %s4484_s29 = scalar_select %p2952_p8, 1, 0 }
  0x12   : > { %p2517_p9 = pneg %p2952_p8  ;;  %s225_s10 = sshll.u32 %s2864_s9, 4  ;;  %s2964_s10 = int_to_ptr.vmem [resolvable:$true] %s225_s10 }
  0x13   : > { %p2674_p11 = scmp.ne.s32.totalorder %s4447_s3, %s2673_s13  ;;  %p2680_p3 = scmp.lt.u32.totalorder %s2673_s13, %s4447_s3 }
  0x14   : > { %p2960_p10 = pnand %p2517_p9, %p4451_p1 }
  0x16   : > { %p2675_p12 = pneg %p2960_p10 }
  0x18   : > { %p2676_p13 = pnand %p2675_p12, %p2674_p11 }
  0x1a   : > { %p2677_p0 = pneg %p2676_p13 }
  0x1c   : > { %p2682_p5 = pnand %p2680_p3, %p2677_p0 }
  0x1e   : > { %2685 = shalt.err (!%p2682_p5)
}
  0x1f   : > { %s2686_s18 = scalar_lea.vmem %s213_s7, 4096  ;;  %p2694_p2 = scmp.lt.s32.totalorder %s213_s7, %s213_s7 }
  0x20   : > { %p2687_p7 = scmp.ne.s32.totalorder %s213_s7, %s2686_s18  ;;  %p2695_p6 = scmp.lt.s32.totalorder %s2686_s18, %s2686_s18 }
  0x22   : > { %p2689_p9 = pnand %p2687_p7, %p2675_p12  ;;  %p2696_p4 = por %p2695_p6, %p2694_p2 }
  0x24   : > { %p2690_p1 = pneg %p2689_p9 }
  0x26   : > { %p2697_p8 = pnand %p2696_p4, %p2690_p1 }
  0x28   : > { %2700 = shalt.err (!%p2697_p8)
}
  0x29   : > { %s2865_s19 = smov 256   ;;  %s2866_s20 = smov 16  }
  0x2a   : > { %2520 = dma.hbm_to_vmem [thread:$0]  (!%p2960_p10), %s4447_s3, 4096, %s213_s7, [#allocation8], %s2865_s19, %s2865_s19, %s2866_s20  }
  0x2b   : > { %s2701_s12 = scalar_lea.hbm %s4448_s4, 4096 }
  0x2c   : > { %p2702_p11 = scmp.ne.s32.totalorder %s4448_s4, %s2701_s12  ;;  %p2708_p4 = scmp.lt.u32.totalorder %s2701_s12, %s4448_s4 }
  0x2e   : > { %p2704_p1 = pnand %p2702_p11, %p2675_p12 }
  0x30   : > { %p2705_p2 = pneg %p2704_p1 }
  0x32   : > { %p2710_p6 = pnand %p2708_p4, %p2705_p2 }
  0x34   : > { %2713 = shalt.err (!%p2710_p6)
}
  0x35   : > { %s2714_s7 = scalar_lea.vmem %s2964_s10, 4096  ;;  %p2722_p3 = scmp.lt.s32.totalorder %s2964_s10, %s2964_s10 }
  0x36   : > { %p2715_p8 = scmp.ne.s32.totalorder %s2964_s10, %s2714_s7  ;;  %p2723_p5 = scmp.lt.s32.totalorder %s2714_s7, %s2714_s7 }
  0x38   : > { %p2717_p13 = pnand %p2715_p8, %p2675_p12  ;;  %p2724_p7 = por %p2723_p5, %p2722_p3 }
  0x3a   : > { %p2718_p0 = pneg %p2717_p13 }
  0x3c   : > { %p2725_p9 = pnand %p2724_p7, %p2718_p0 }
  0x3e   : > { %2728 = shalt.err (!%p2725_p9)
}
  0x3f   : > { %s2867_s17 = smov 64   ;;  %s2868_s18 = smov 4  }
  0x40   : > { %2523 = dma.hbm_to_vmem [thread:$0]  (!%p2960_p10), %s4448_s4, 4096, %s2964_s10, [#allocation8], %s2867_s17, %s2867_s17, %s2868_s18  }
  0x41   : > { %s3014_s26 = sadd.s32 1, %s2861_s24   ;;  %s34_s9 = sadd.s32 1, %s2857_s23 }
  0x42   : > { %s31_s30 = ssub.s32 %s2861_s24, %s3014_s26  ;;  %p41_p11 = scmp.ne.s32.totalorder %s2857_s23, %s2853_s22 }
  0x43   : > { %p32_p12 = scmp.eq.s32.totalorder %s31_s30, 0  ;;  %p42_p1 = scmp.eq.s32.totalorder %s2861_s24, 0 }
  0x44   : > { %p4486_p4 = scmp.eq.s32.totalorder %s2933_s25, 3  ;;  %p2537_p8 = scmp.lt.s32.totalorder %s2861_s24, 4 }
  0x45   : > { %s3023_s11 = scalar_select %p32_p12, %s2857_s23, %s34_s9  }
  0x46   : > { %p43_p2 = por %p42_p1, %p41_p11  ;;  %p3027_p6 = por %p4486_p4, %p41_p11 }
  0x47   : > { %s239_s8 = sand.u32 1, %s2857_s23   ;;  %s2373_s10 = sshll.u32 %s2861_s24, 10 }
  0x48   : > { %s2291_s13 = sshll.u32 %s239_s8, 6  ;;  %s3037_s16 = scalar_lea.hbm %s4444_s0, %s2373_s10 }
  0x49   : > { %s243_s7 = scalar_lea.vmem [#allocation4], %s2291_s13  ;;  %p3041_p10 = pnand %p2537_p8, %p43_p2 }
  0x4a   : > { %s250_s17 = sshll.u32 %s243_s7, 4  ;;  %s3045_s19 = scalar_lea.sflag [#allocation5], %s239_s8  ;;  %s3039_s17 = int_to_ptr.vmem [resolvable:$true] %s250_s17 }
  0x4b   : > { %s2729_s20 = scalar_lea.hbm %s3037_s16, 1024  ;;  %p2731_p0 = pneg %p3041_p10 }
  0x4c   : > { %p2730_p13 = scmp.ne.s32.totalorder %s3037_s16, %s2729_s20  ;;  %s2734_s13 = scalar_lea.hbm %s4444_s0, 4096 }
  0x4d   : > { %p2735_p7 = scmp.lt.u32.totalorder %s3037_s16, %s4444_s0  ;;  %p2736_p9 = scmp.lt.u32.totalorder %s2734_s13, %s2729_s20 }
  0x4e   : > { %p2732_p3 = pnand %p2731_p0, %p2730_p13  ;;  %p2738_p11 = scmp.lt.u32.totalorder %s2729_s20, %s3037_s16 }
  0x4f   : > { %p2737_p12 = por %p2736_p9, %p2735_p7 }
  0x50   : > { %p2733_p5 = pneg %p2732_p3 }
  0x51   : > { %p2739_p1 = por %p2738_p11, %p2737_p12 }
  0x53   : > { %p2740_p2 = pnand %p2739_p1, %p2733_p5 }
  0x55   : > { %2743 = shalt.err (!%p2740_p2)
}
  0x56   : > { %s2744_s8 = scalar_lea.vmem %s3039_s17, 1024  ;;  %s2869_s15 = smov [#allocation4]  }
  0x57   : > { %p2745_p4 = scmp.ne.s32.totalorder %s3039_s17, %s2744_s8  ;;  %s2749_s7 = sshll.u32 %s2869_s15, 4  ;;  %s2750_s7 = int_to_ptr.vmem [resolvable:$false] %s2749_s7 }
  0x58   : > { %s2751_s30 = scalar_lea.vmem %s2750_s7, 2048  ;;  %p2752_p3 = scmp.lt.s32.totalorder %s3039_s17, %s2750_s7 }
  0x59   : > { %p2747_p8 = pnand %p2745_p4, %p2731_p0  ;;  %p2753_p7 = scmp.lt.s32.totalorder %s2751_s30, %s2744_s8 }
  0x5b   : > { %p2748_p13 = pneg %p2747_p8  ;;  %p2754_p9 = por %p2753_p7, %p2752_p3 }
  0x5d   : > { %p2755_p12 = pnand %p2754_p9, %p2748_p13 }
  0x5f   : > { %2758 = shalt.err (!%p2755_p12)
}
  0x60   : > { %s2870_s20 = smov 128   ;;  %s2871_s9 = smov 8  }
  0x61   : > { %2527 = dma.hbm_to_vmem [thread:$0]  (!%p3041_p10), %s3037_s16, 1024, %s3039_s17, %s3045_s19, %s2870_s20, %s2870_s20, %s2871_s9  }
  0x62   : > { %p4489_p0 = scmp.ne.s32.totalorder %s4484_s29, 0 }
  0x64   : > { %262 = sbr.rel (%p4489_p0) target bundleno = 1863 (0x747), region = 40 }
  0x6b   : > { %s3076_s13 = sand.u32 1, %s2853_s22   ;;  %p4490_p5 = scmp.ne.s32.totalorder %s4482_s27, 0 }
  0x6c   : > { %s2295_s10 = sshll.u32 %s3076_s13, 6  ;;  %s265_s14 = scalar_lea.sflag [#allocation5], %s3076_s13 }
  0x6d   : > { %s3082_s8 = scalar_lea.vmem [#allocation4], %s2295_s10 }
  0x6e   : > { %2832 = dma.done.wait (%p4490_p5), %s265_s14, 1024  }
  0x6f   : > { %2834 = vsyncadd (%p4490_p5), %s265_s14, 4294966272  ;;  %p4491_p10 = scmp.eq.s32.totalorder %s2933_s25, 0 }
  0x71   : > { %2836 = dma.done.wait (%p4491_p10), [#allocation8], 8192   ;;  %p4492_p11 = pmov %p4491_p10 }
  0x72   : > { %v2872_v0 = vmov 0   ;;  %v2584_v1 = vld [vmem:[#allocation7 + $0x4] ss:$16 sps:$4 sm:$0xff]   ;;  %v2586_v2 = vld [vmem:[#allocation7 + $0xc] ss:$16 sps:$4 sm:$0xff]   ;;  %s4327_s15 = scalar_lea.vmem [#allocation10], %s2295_s10 }
  0x73   : > { %2838 = vsyncadd (%p4492_p11), [#allocation8], 4294959104  ;;  %564 = vmatprep.mubr.bf16.mxu0 %v2872_v0  ;;  %637 = vmatprep.mubr.bf16.mxu1 %v2872_v0  ;;  %v2588_v3 = vld [vmem:[#allocation7] ss:$16 sps:$4 sm:$0xff]   ;;  %v2589_v4 = vld [vmem:[#allocation7 + $0x8] ss:$16 sps:$4 sm:$0xff]  }
  0x74   : > { %532 = vmatprep.subr.bf16.mxu0 %v2584_v1  ;;  %605 = vmatprep.subr.bf16.mxu1 %v2586_v2  ;;  %v2590_v5 = vld [vmem:[#allocation7 + $0x24] ss:$16 sps:$4 sm:$0xff]   ;;  %v2592_v6 = vld [vmem:[#allocation7 + $0x2c] ss:$16 sps:$4 sm:$0xff]   ;;  %v2594_v7 = vld [vmem:[#allocation7 + $0x20] ss:$16 sps:$4 sm:$0xff]  }
  0x75   : > { %533 = vmatpush1.bf16.msra.mxu0 %v2588_v3  ;;  %606 = vmatpush1.bf16.msra.mxu1 %v2589_v4  ;;  %v2595_v8 = vld [vmem:[#allocation7 + $0x28] ss:$16 sps:$4 sm:$0xff]   ;;  %v2596_v9 = vld [vmem:[#allocation7 + $0x44] ss:$16 sps:$4 sm:$0xff]   ;;  %v2598_v10 = vld [vmem:[#allocation7 + $0x4c] ss:$16 sps:$4 sm:$0xff]  }
  0x76   : > { %534 = vmatprep.subr.bf16.mxu0 %v2590_v5  ;;  %607 = vmatprep.subr.bf16.mxu1 %v2592_v6  ;;  %v2600_v11 = vld [vmem:[#allocation7 + $0x40] ss:$16 sps:$4 sm:$0xff]   ;;  %v2601_v12 = vld [vmem:[#allocation7 + $0x48] ss:$16 sps:$4 sm:$0xff]   ;;  %v2602_v13 = vld [vmem:[#allocation7 + $0x64] ss:$16 sps:$4 sm:$0xff]  }
  0x77   : > { %v2604_v14 = vld [vmem:[#allocation7 + $0x6c] ss:$16 sps:$4 sm:$0xff]   ;;  %v2606_v15 = vld [vmem:[#allocation7 + $0x60] ss:$16 sps:$4 sm:$0xff]   ;;  %v2607_v16 = vld [vmem:[#allocation7 + $0x68] ss:$16 sps:$4 sm:$0xff]  }
  0x78   : > { %v2608_v17 = vld [vmem:[#allocation7 + $0x84] ss:$16 sps:$4 sm:$0xff]   ;;  %v2610_v18 = vld [vmem:[#allocation7 + $0x8c] ss:$16 sps:$4 sm:$0xff]   ;;  %v2612_v19 = vld [vmem:[#allocation7 + $0x80] ss:$16 sps:$4 sm:$0xff]  }
  0x79   : > { %535 = vmatpush1.bf16.msra.mxu0 %v2594_v7  ;;  %608 = vmatpush1.bf16.msra.mxu1 %v2595_v8  ;;  %v2613_v20 = vld [vmem:[#allocation7 + $0x88] ss:$16 sps:$4 sm:$0xff]   ;;  %v2614_v21 = vld [vmem:[#allocation7 + $0xa4] ss:$16 sps:$4 sm:$0xff]   ;;  %v2616_v22 = vld [vmem:[#allocation7 + $0xac] ss:$16 sps:$4 sm:$0xff]  }
  0x7a   : > { %536 = vmatprep.subr.bf16.mxu0 %v2596_v9  ;;  %609 = vmatprep.subr.bf16.mxu1 %v2598_v10  ;;  %v2618_v23 = vld [vmem:[#allocation7 + $0xa0] ss:$16 sps:$4 sm:$0xff]   ;;  %v2619_v24 = vld [vmem:[#allocation7 + $0xa8] ss:$16 sps:$4 sm:$0xff]   ;;  %v2620_v25 = vld [vmem:[#allocation7 + $0xc4] ss:$16 sps:$4 sm:$0xff]  }
  0x7b   : > { %v2622_v26 = vld [vmem:[#allocation7 + $0xcc] ss:$16 sps:$4 sm:$0xff]   ;;  %v2624_v27 = vld [vmem:[#allocation7 + $0xc0] ss:$16 sps:$4 sm:$0xff]   ;;  %v2625_v28 = vld [vmem:[#allocation7 + $0xc8] ss:$16 sps:$4 sm:$0xff]  }
  0x7c   : > { %v2626_v29 = vld [vmem:[#allocation7 + $0xe4] ss:$16 sps:$4 sm:$0xff]   ;;  %v2628_v30 = vld [vmem:[#allocation7 + $0xec] ss:$16 sps:$4 sm:$0xff]   ;;  %v2300_v33 = vld [vmem:[%s4446_s2] ss:$0 sm:$0xff] }
  0x7d   : > { %537 = vmatpush1.bf16.msra.mxu0 %v2600_v11  ;;  %610 = vmatpush1.bf16.msra.mxu1 %v2601_v12  ;;  %v313_v31 = vld [vmem:[%s3082_s8] sm:$0xff]  ;;  %v314_v32 = vld [vmem:[%s3082_s8 + $0x8] sm:$0xff]  ;;  %v315_v38 = vld [vmem:[%s3082_s8 + $0x10] sm:$0xff]  ;;  %s2147_s7 = sshll.u32 %s4327_s15, 4  ;;  %s2374_s30 = sshll.u32 %s2933_s25, 10  ;;  %s4360_s7 = int_to_ptr.vmem [resolvable:$true] %s2147_s7 }
  0x7e   : > { %538 = vmatprep.subr.bf16.mxu0 %v2602_v13  ;;  %611 = vmatprep.subr.bf16.mxu1 %v2604_v14  ;;  %v2630_v34 = vld [vmem:[#allocation7 + $0xe0] ss:$16 sps:$4 sm:$0xff]   ;;  %v2631_v35 = vld [vmem:[#allocation7 + $0xe8] ss:$16 sps:$4 sm:$0xff]   ;;  %v328_v36 = vsub.f32 %v313_v31, %v2300_v33  ;;  %v329_v37 = vsub.f32 %v314_v32, %v2300_v33  ;;  %v330_v41 = vsub.f32 %v315_v38, %v2300_v33  ;;  %s4366_s10 = scalar_lea.hbm %s4449_s5, %s2374_s30  ;;  %s2129_s14 = scalar_lea.sflag [#allocation6], %s3076_s13 }
  0x7f   : > { %v316_v39 = vld [vmem:[%s3082_s8 + $0x18] sm:$0xff]  ;;  %v317_v43 = vld [vmem:[%s3082_s8 + $0x20] sm:$0xff]  ;;  %v318_v44 = vld [vmem:[%s3082_s8 + $0x28] sm:$0xff]  ;;  %s2873_s27 = smov [#allocation10]  }
  0x80   : > { %v336_v40 = vpack.c.bf16 %v329_v37, %v328_v36  ;;  %v331_v42 = vsub.f32 %v316_v39, %v2300_v33  ;;  %v332_v46 = vsub.f32 %v317_v43, %v2300_v33  ;;  %v333_v47 = vsub.f32 %v318_v44, %v2300_v33  ;;  %v319_v49 = vld [vmem:[%s3082_s8 + $0x30] sm:$0xff]  ;;  %v320_v50 = vld [vmem:[%s3082_s8 + $0x38] sm:$0xff]  ;;  %s2763_s29 = sshll.u32 %s2873_s27, 4  ;;  %s2764_s29 = int_to_ptr.vmem [resolvable:$false] %s2763_s29 }
  0x81   : > { %539 = vmatpush1.bf16.msra.mxu0 %v2606_v15  ;;  %612 = vmatpush1.bf16.msra.mxu1 %v2607_v16  ;;  %v334_v51 = vsub.f32 %v319_v49, %v2300_v33  ;;  %v335_v52 = vsub.f32 %v320_v50, %v2300_v33  ;;  %s2765_s16 = scalar_lea.vmem %s2764_s29, 2048  ;;  %p2766_p8 = scmp.lt.s32.totalorder %s4360_s7, %s2764_s29 }
  0x82   : > { %540 = vmatprep.subr.bf16.mxu0 %v2608_v17  ;;  %613 = vmatprep.subr.bf16.mxu1 %v2610_v18  ;;  %v337_v45 = vpack.c.bf16 %v331_v42, %v330_v41  ;;  %v338_v48 = vpack.c.bf16 %v333_v47, %v332_v46 }
  0x83   : > { %v339_v53 = vpack.c.bf16 %v335_v52, %v334_v51 }
  0x85   : > { %541 = vmatpush1.bf16.msra.mxu0 %v2612_v19  ;;  %614 = vmatpush1.bf16.msra.mxu1 %v2613_v20 }
  0x86   : > { %542 = vmatprep.subr.bf16.mxu0 %v2614_v21  ;;  %615 = vmatprep.subr.bf16.mxu1 %v2616_v22 }
  0x89   : > { %543 = vmatpush1.bf16.msra.mxu0 %v2618_v23  ;;  %616 = vmatpush1.bf16.msra.mxu1 %v2619_v24 }
  0x8a   : > { %544 = vmatprep.subr.bf16.mxu0 %v2620_v25  ;;  %617 = vmatprep.subr.bf16.mxu1 %v2622_v26 }
  0x8d   : > { %545 = vmatpush1.bf16.msra.mxu0 %v2624_v27  ;;  %618 = vmatpush1.bf16.msra.mxu1 %v2625_v28 }
  0x8e   : > { %546 = vmatprep.subr.bf16.mxu0 %v2626_v29  ;;  %619 = vmatprep.subr.bf16.mxu1 %v2628_v30 }
  0x91   : > { %547 = vmatpush1.bf16.msra.mxu0 %v2630_v34  ;;  %620 = vmatpush1.bf16.msra.mxu1 %v2631_v35 }
  0x94   : > { %565 = vmatmul.mubr.bf16.vlgmr.msra.gmra.mrb[0].mxu0 %v336_v40  ;;  %638 = vmatmul.mubr.bf16.vlgmr.msra.gmra.mrb[0].mxu1 %v336_v40 }
  0x95   : > { %574 = vmatprep.mubr.bf16.mxu0 %v2872_v0  ;;  %647 = vmatprep.mubr.bf16.mxu1 %v2872_v0 }
  0x9c   : > { %575 = vmatmul.mubr.bf16.gmra.mrb[4].mxu0 %v337_v45  ;;  %648 = vmatmul.mubr.bf16.gmra.mrb[4].mxu1 %v337_v45 }
  0x9d   : > { %584 = vmatprep.mubr.bf16.mxu0 %v2872_v0  ;;  %657 = vmatprep.mubr.bf16.mxu1 %v2872_v0 }
  0xa4   : > { %585 = vmatmul.mubr.bf16.gmra.mrb[8].mxu0 %v338_v48  ;;  %658 = vmatmul.mubr.bf16.gmra.mrb[8].mxu1 %v338_v48 }
  0xa5   : > { %594 = vmatprep.mubr.bf16.mxu0 %v2872_v0  ;;  %667 = vmatprep.mubr.bf16.mxu1 %v2872_v0 }
  0xac   : > { %595 = vmatmul.mubr.bf16.gmra.mrb[12].mxu0 %v339_v53  ;;  %668 = vmatmul.mubr.bf16.gmra.mrb[12].mxu1 %v339_v53 }
 0x167   : > { %v566_v54 = vpop.f32.mrb[0].mxu0  ;;  %v639_v55 = vpop.f32.mrb[0].mxu1 }
 0x168   : > { %v3111_v56 = vmax.f32 %v566_v54, 0.0  ;;  %v568_v57 = vpop.f32.mrb[1].mxu0  ;;  %v641_v58 = vpop.f32.mrb[1].mxu1  ;;  %v3113_v59 = vmax.f32 %v639_v55, 0.0 }
 0x169   : > { %v3115_v60 = vmax.f32 %v568_v57, 0.0  ;;  %v570_v61 = vpop.f32.mrb[2].mxu0  ;;  %v643_v62 = vpop.f32.mrb[2].mxu1  ;;  %v3123_v4 = vmax.f32 %v641_v58, 0.0 }
 0x16a   : > { %v3117_v63 = vmax.f32 %v570_v61, 0.0  ;;  %v572_v1 = vpop.f32.mrb[3].mxu0  ;;  %v645_v2 = vpop.f32.mrb[3].mxu1  ;;  %v3125_v5 = vmax.f32 %v643_v62, 0.0 }
 0x16b   : > { %v3119_v0 = vmax.f32 %v572_v1, 0.0  ;;  %v761_v3 = vmax.f32 %v3111_v56, %v3115_v60  ;;  %v3134_v15 = vmax.f32 %v645_v2, 0.0 }
 0x16d   : > { %v762_v6 = vmax.f32 %v761_v3, %v3113_v59  ;;  %v766_v7 = vmax.f32 %v3117_v63, %v3119_v0 }
 0x16f   : > { %v576_v8 = vpop.f32.mrb[4].mxu0  ;;  %v649_v9 = vpop.f32.mrb[4].mxu1  ;;  %v763_v10 = vmax.f32 %v762_v6, %v3123_v4  ;;  %v767_v11 = vmax.f32 %v766_v7, %v3125_v5 }
 0x170   : > { %v3132_v12 = vmax.f32 %v576_v8, 0.0  ;;  %v578_v13 = vpop.f32.mrb[5].mxu0  ;;  %v651_v14 = vpop.f32.mrb[5].mxu1  ;;  %v3136_v16 = vmax.f32 %v649_v9, 0.0 }
 0x171   : > { %v3138_v17 = vmax.f32 %v578_v13, 0.0  ;;  %v653_v18 = vpop.f32.mrb[6].mxu1  ;;  %764 = vmax.xlane.f32.xlu0 %v763_v10  ;;  %v580_v19 = vpop.f32.mrb[6].mxu0  ;;  %v768_v24 = vmax.f32 %v767_v11, %v3134_v15  ;;  %v3147_v26 = vmax.f32 %v651_v14, 0.0 }
 0x172   : > { %v3140_v20 = vmax.f32 %v580_v19, 0.0  ;;  %v582_v21 = vpop.f32.mrb[7].mxu0  ;;  %v655_v22 = vpop.f32.mrb[7].mxu1  ;;  %v3149_v27 = vmax.f32 %v653_v18, 0.0 }
 0x173   : > { %v3142_v23 = vmax.f32 %v582_v21, 0.0  ;;  %v771_v25 = vmax.f32 %v3132_v12, %v3138_v17  ;;  %v3158_v37 = vmax.f32 %v655_v22, 0.0 }
 0x175   : > { %769 = vmax.xlane.f32.xlu0 %v768_v24  ;;  %v772_v28 = vmax.f32 %v771_v25, %v3136_v16  ;;  %v776_v29 = vmax.f32 %v3140_v20, %v3142_v23 }
 0x177   : > { %v586_v30 = vpop.f32.mrb[8].mxu0  ;;  %v659_v31 = vpop.f32.mrb[8].mxu1  ;;  %v773_v32 = vmax.f32 %v772_v28, %v3147_v26  ;;  %v777_v33 = vmax.f32 %v776_v29, %v3149_v27 }
 0x178   : > { %v3156_v34 = vmax.f32 %v586_v30, 0.0  ;;  %v588_v35 = vpop.f32.mrb[9].mxu0  ;;  %v661_v36 = vpop.f32.mrb[9].mxu1  ;;  %v3162_v39 = vmax.f32 %v659_v31, 0.0 }
 0x179   : > { %v3160_v38 = vmax.f32 %v588_v35, 0.0  ;;  %774 = vmax.xlane.f32.xlu1 %v773_v32  ;;  %v590_v40 = vpop.f32.mrb[10].mxu0  ;;  %v663_v41 = vpop.f32.mrb[10].mxu1  ;;  %v3166_v44 = vmax.f32 %v661_v36, 0.0  ;;  %v778_v48 = vmax.f32 %v777_v33, %v3158_v37 }
 0x17a   : > { %4493 = vst [vmem:[#allocation17_spill] sm:$0xff] %v3156_v34  ;;  %4494 = vst [vmem:[#allocation18_spill] sm:$0xff] %v3162_v39  ;;  %v3164_v42 = vmax.f32 %v590_v40, 0.0  ;;  %v592_v43 = vpop.f32.mrb[11].mxu0  ;;  %v665_v45 = vpop.f32.mrb[11].mxu1  ;;  %v3170_v47 = vmax.f32 %v663_v41, 0.0 }
 0x17b   : > { %4496 = vst [vmem:[#allocation20_spill] sm:$0xff] %v3166_v44  ;;  %v3168_v46 = vmax.f32 %v592_v43, 0.0  ;;  %v1215_v49 = vmax.f32 %v3156_v34, %v3160_v38  ;;  %v3178_v52 = vmax.f32 %v665_v45, 0.0 }
 0x17c   : > { %4495 = vst [vmem:[#allocation19_spill] sm:$0xff] %v3164_v42  ;;  %4497 = vst [vmem:[#allocation21_spill] sm:$0xff] %v3170_v47 }
 0x17d   : > { %779 = vmax.xlane.f32.xlu1 %v778_v48  ;;  %v1216_v50 = vmax.f32 %v1215_v49, %v3162_v39  ;;  %v1220_v51 = vmax.f32 %v3164_v42, %v3168_v46  ;;  %4498 = vst [vmem:[#allocation22_spill] sm:$0xff] %v3178_v52 }
 0x17f   : > { %v596_v53 = vpop.f32.mrb[12].mxu0  ;;  %v669_v54 = vpop.f32.mrb[12].mxu1  ;;  %v1217_v55 = vmax.f32 %v1216_v50, %v3166_v44  ;;  %v1221_v57 = vmax.f32 %v1220_v51, %v3170_v47 }
 0x180   : > { %v3182_v58 = vmax.f32 %v596_v53, 0.0  ;;  %v598_v61 = vpop.f32.mrb[13].mxu0  ;;  %v671_v62 = vpop.f32.mrb[13].mxu1  ;;  %v3186_v2 = vmax.f32 %v669_v54, 0.0 }
 0x181   : > { %v3184_v1 = vmax.f32 %v598_v61, 0.0  ;;  %1218 = vmax.xlane.f32.xlu0 %v1217_v55  ;;  %v600_v3 = vpop.f32.mrb[14].mxu0  ;;  %v673_v6 = vpop.f32.mrb[14].mxu1  ;;  %v1222_v7 = vmax.f32 %v1221_v57, %v3178_v52  ;;  %v3193_v13 = vmax.f32 %v671_v62, 0.0 }
 0x182   : > { %4499 = vst [vmem:[#allocation23_spill] sm:$0xff] %v3182_v58  ;;  %4501 = vst [vmem:[#allocation25_spill] sm:$0xff] %v3186_v2  ;;  %v3189_v8 = vmax.f32 %v600_v3, 0.0  ;;  %v602_v9 = vpop.f32.mrb[15].mxu0  ;;  %v675_v10 = vpop.f32.mrb[15].mxu1  ;;  %v3195_v14 = vmax.f32 %v673_v6, 0.0 }
 0x183   : > { %4500 = vst [vmem:[#allocation24_spill] sm:$0xff] %v3184_v1  ;;  %v3191_v11 = vmax.f32 %v602_v9, 0.0  ;;  %4504 = vst [vmem:[#allocation28_spill] sm:$0xff] %v3193_v13  ;;  %1223 = vmax.xlane.f32.xlu1 %v1222_v7  ;;  %v1225_v18 = vmax.f32 %v3182_v58, %v3184_v1  ;;  %v3202_v22 = vmax.f32 %v675_v10, 0.0 }
 0x184   : > { %4502 = vst [vmem:[#allocation26_spill] sm:$0xff] %v3189_v8  ;;  %4505 = vst [vmem:[#allocation29_spill] sm:$0xff] %v3195_v14 }
 0x185   : > { %4503 = vst [vmem:[#allocation27_spill] sm:$0xff] %v3191_v11  ;;  %v1226_v19 = vmax.f32 %v1225_v18, %v3186_v2  ;;  %v1230_v21 = vmax.f32 %v3189_v8, %v3191_v11  ;;  %4506 = vst [vmem:[#allocation30_spill] sm:$0xff] %v3202_v22 }
 0x187   : > { %v1227_v24 = vmax.f32 %v1226_v19, %v3193_v13  ;;  %v1231_v25 = vmax.f32 %v1230_v21, %v3195_v14 }
 0x189   : > { %1228 = vmax.xlane.f32.xlu0 %v1227_v24  ;;  %v1232_v28 = vmax.f32 %v1231_v25, %v3202_v22 }
 0x18b   : > { %1233 = vmax.xlane.f32.xlu1 %v1232_v28 }
 0x1fe   : > { %v765_v29 = vpop.xlane.xlu0 %764 }
 0x1ff   : > { %vm781_vm0 = vcmp.ge.f32.partialorder %v3111_v56, %v765_v29  ;;  %vm782_vm1 = vcmp.ge.f32.partialorder %v3115_v60, %v765_v29  ;;  %vm783_vm2 = vcmp.ge.f32.partialorder %v3113_v59, %v765_v29  ;;  %vm784_vm3 = vcmp.ge.f32.partialorder %v3123_v4, %v765_v29 }
 0x200   : > { %v3211_v30 = vsel %vm781_vm0, -inf, %v3111_v56  ;;  %v3214_v31 = vsel %vm782_vm1, -inf, %v3115_v60  ;;  %v3220_v35 = vsel %vm783_vm2, -inf, %v3113_v59  ;;  %v3233_v43 = vsel %vm784_vm3, -inf, %v3123_v4 }
 0x201   : > { %v813_v32 = vmax.f32 %v3211_v30, %v3214_v31 }
 0x202   : > { %v770_v33 = vpop.xlane.xlu0 %769 }
 0x203   : > { %vm785_vm4 = vcmp.ge.f32.partialorder %v3117_v63, %v770_v33  ;;  %vm786_vm5 = vcmp.ge.f32.partialorder %v3119_v0, %v770_v33  ;;  %vm787_vm6 = vcmp.ge.f32.partialorder %v3125_v5, %v770_v33  ;;  %v814_v36 = vmax.f32 %v813_v32, %v3220_v35 }
 0x204   : > { %v3227_v40 = vsel %vm785_vm4, -inf, %v3117_v63  ;;  %v3230_v41 = vsel %vm786_vm5, -inf, %v3119_v0  ;;  %vm788_vm7 = vcmp.ge.f32.partialorder %v3134_v15, %v770_v33  ;;  %v3240_v50 = vsel %vm787_vm6, -inf, %v3125_v5 }
 0x205   : > { %v815_v45 = vmax.f32 %v814_v36, %v3233_v43  ;;  %v818_v48 = vmax.f32 %v3227_v40, %v3230_v41  ;;  %v3253_v55 = vsel %vm788_vm7, -inf, %v3134_v15 }
 0x206   : > { %v775_v49 = vpop.xlane.xlu1 %774 }
 0x207   : > { %vm789_vm8 = vcmp.ge.f32.partialorder %v3132_v12, %v775_v49  ;;  %vm790_vm9 = vcmp.ge.f32.partialorder %v3138_v17, %v775_v49  ;;  %vm791_vm10 = vcmp.ge.f32.partialorder %v3136_v16, %v775_v49  ;;  %816 = vmax.xlane.f32.xlu0 %v815_v45  ;;  %v819_v51 = vmax.f32 %v818_v48, %v3240_v50 }
 0x208   : > { %v3247_v53 = vsel %vm789_vm8, -inf, %v3132_v12  ;;  %v3250_v54 = vsel %vm790_vm9, -inf, %v3138_v17  ;;  %vm792_vm11 = vcmp.ge.f32.partialorder %v3147_v26, %v775_v49  ;;  %v3260_v3 = vsel %vm791_vm10, -inf, %v3136_v16 }
 0x209   : > { %v820_v57 = vmax.f32 %v819_v51, %v3253_v55  ;;  %v823_v61 = vmax.f32 %v3247_v53, %v3250_v54  ;;  %v3273_v10 = vsel %vm792_vm11, -inf, %v3147_v26 }
 0x20a   : > { %v780_v62 = vpop.xlane.xlu1 %779 }
 0x20b   : > { %vm793_vm12 = vcmp.ge.f32.partialorder %v3140_v20, %v780_v62  ;;  %vm794_vm13 = vcmp.ge.f32.partialorder %v3142_v23, %v780_v62  ;;  %vm795_vm14 = vcmp.ge.f32.partialorder %v3149_v27, %v780_v62  ;;  %821 = vmax.xlane.f32.xlu1 %v820_v57  ;;  %v824_v6 = vmax.f32 %v823_v61, %v3260_v3 }
 0x20c   : > { %v3267_v7 = vsel %vm793_vm12, -inf, %v3140_v20  ;;  %v3270_v9 = vsel %vm794_vm13, -inf, %v3142_v23  ;;  %vm796_vm15 = vcmp.ge.f32.partialorder %v3158_v37, %v780_v62  ;;  %v3280_v24 = vsel %vm795_vm14, -inf, %v3149_v27 }
 0x20d   : > { %v825_v18 = vmax.f32 %v824_v6, %v3273_v10  ;;  %v828_v19 = vmax.f32 %v3267_v7, %v3270_v9  ;;  %v3293_v33 = vsel %vm796_vm15, -inf, %v3158_v37 }
 0x20e   : > { %v1219_v21 = vpop.xlane.xlu0 %1218 }
 0x20f   : > { %vm1235_vm0 = vcmp.ge.f32.partialorder %v3156_v34, %v1219_v21  ;;  %vm1236_vm1 = vcmp.ge.f32.partialorder %v3160_v38, %v1219_v21  ;;  %826 = vmax.xlane.f32.xlu0 %v825_v18  ;;  %v829_v25 = vmax.f32 %v828_v19, %v3280_v24  ;;  %vm1237_vm2 = vcmp.ge.f32.partialorder %v3162_v39, %v1219_v21 }
 0x210   : > { %v3287_v28 = vsel %vm1235_vm0, -inf, %v3156_v34  ;;  %v3290_v29 = vsel %vm1236_vm1, -inf, %v3160_v38  ;;  %v1224_v32 = vpop.xlane.xlu1 %1223  ;;  %vm1238_vm6 = vcmp.ge.f32.partialorder %v3166_v44, %v1219_v21  ;;  %v3309_v51 = vsel %vm1237_vm2, -inf, %v3162_v39 }
 0x211   : > { %vm1239_vm3 = vcmp.ge.f32.partialorder %v3164_v42, %v1224_v32  ;;  %vm1240_vm4 = vcmp.ge.f32.partialorder %v3168_v46, %v1224_v32  ;;  %vm1241_vm5 = vcmp.ge.f32.partialorder %v3170_v47, %v1224_v32  ;;  %v830_v36 = vmax.f32 %v829_v25, %v3293_v33 }
 0x212   : > { %v3300_v45 = vsel %vm1239_vm3, -inf, %v3164_v42  ;;  %v3303_v48 = vsel %vm1240_vm4, -inf, %v3168_v46  ;;  %v1267_v49 = vmax.f32 %v3287_v28, %v3290_v29  ;;  %vm1242_vm7 = vcmp.ge.f32.partialorder %v3178_v52, %v1224_v32  ;;  %v2635_v42 = vld [vmem:[#allocation9 + $0x80] sm:$0xff]  }
 0x213   : > { %831 = vmax.xlane.f32.xlu1 %v830_v36  ;;  %v1272_v57 = vmax.f32 %v3300_v45, %v3303_v48  ;;  %v3316_v62 = vsel %vm1241_vm5, -inf, %v3170_v47  ;;  %v3319_v6 = vsel %vm1238_vm6, -inf, %v3166_v44  ;;  %v3324_v25 = vsel %vm1242_vm7, -inf, %v3178_v52  ;;  %v2633_v47 = vld [vmem:[#allocation9] sm:$0xff]   ;;  %v2639_v44 = vld [vmem:[#allocation9 + $0x88] sm:$0xff]   ;;  %v2646_v52 = vld [vmem:[#allocation9 + $0xd8] sm:$0xff]  }
 0x214   : > { %v1268_v61 = vmax.f32 %v1267_v49, %v3309_v51 }
 0x215   : > { %v1273_v18 = vmax.f32 %v1272_v57, %v3316_v62 }
 0x216   : > { %v1229_v19 = vpop.xlane.xlu0 %1228  ;;  %v1269_v21 = vmax.f32 %v1268_v61, %v3319_v6 }
 0x217   : > { %vm1243_vm8 = vcmp.ge.f32.partialorder %v3182_v58, %v1229_v19  ;;  %vm1244_vm9 = vcmp.ge.f32.partialorder %v3184_v1, %v1229_v19  ;;  %v1274_v32 = vmax.f32 %v1273_v18, %v3324_v25  ;;  %vm1245_vm10 = vcmp.ge.f32.partialorder %v3186_v2, %v1229_v19 }
 0x218   : > { %v3331_v36 = vsel %vm1243_vm8, -inf, %v3182_v58  ;;  %v3334_v49 = vsel %vm1244_vm9, -inf, %v3184_v1  ;;  %1270 = vmax.xlane.f32.xlu0 %v1269_v21  ;;  %v1234_v57 = vpop.xlane.xlu1 %1233  ;;  %vm1246_vm14 = vcmp.ge.f32.partialorder %v3193_v13, %v1229_v19  ;;  %v3349_v21 = vsel %vm1245_vm10, -inf, %v3186_v2 }
 0x219   : > { %vm1247_vm11 = vcmp.ge.f32.partialorder %v3189_v8, %v1234_v57  ;;  %vm1248_vm12 = vcmp.ge.f32.partialorder %v3191_v11, %v1234_v57  ;;  %vm1249_vm13 = vcmp.ge.f32.partialorder %v3195_v14, %v1234_v57  ;;  %1275 = vmax.xlane.f32.xlu1 %v1274_v32  ;;  %v1277_v58 = vmax.f32 %v3331_v36, %v3334_v49 }
 0x21a   : > { %v3340_v61 = vsel %vm1247_vm11, -inf, %v3189_v8  ;;  %v3343_v18 = vsel %vm1248_vm12, -inf, %v3191_v11  ;;  %vm1250_vm15 = vcmp.ge.f32.partialorder %v3202_v22, %v1234_v57  ;;  %v3356_v8 = vsel %vm1249_vm13, -inf, %v3195_v14 }
 0x21b   : > { %v1282_v1 = vmax.f32 %v3340_v61, %v3343_v18  ;;  %v1278_v32 = vmax.f32 %v1277_v58, %v3349_v21  ;;  %v3359_v11 = vsel %vm1246_vm14, -inf, %v3193_v13  ;;  %v3364_v2 = vsel %vm1250_vm15, -inf, %v3202_v22 }
 0x21d   : > { %v1283_v19 = vmax.f32 %v1282_v1, %v3356_v8  ;;  %v1279_v39 = vmax.f32 %v1278_v32, %v3359_v11 }
 0x21f   : > { %v1284_v57 = vmax.f32 %v1283_v19, %v3364_v2  ;;  %1280 = vmax.xlane.f32.xlu0 %v1279_v39 }
 0x221   : > { %1285 = vmax.xlane.f32.xlu1 %v1284_v57 }
 0x294   : > { %v817_v34 = vpop.xlane.xlu0 %816 }
 0x295   : > { %vm833_vm0 = vcmp.ge.f32.partialorder %v3211_v30, %v817_v34  ;;  %vm834_vm1 = vcmp.ge.f32.partialorder %v3214_v31, %v817_v34  ;;  %vm835_vm2 = vcmp.ge.f32.partialorder %v3220_v35, %v817_v34  ;;  %vm836_vm3 = vcmp.ge.f32.partialorder %v3233_v43, %v817_v34 }
 0x296   : > { %v3371_v58 = vsel %vm833_vm0, -inf, %v3211_v30  ;;  %v3374_v1 = vsel %vm834_vm1, -inf, %v3214_v31  ;;  %v3380_v19 = vsel %vm835_vm2, -inf, %v3220_v35  ;;  %v3393_v57 = vsel %vm836_vm3, -inf, %v3233_v43 }
 0x297   : > { %v865_v32 = vmax.f32 %v3371_v58, %v3374_v1 }
 0x298   : > { %v822_v39 = vpop.xlane.xlu1 %821 }
 0x299   : > { %vm837_vm4 = vcmp.ge.f32.partialorder %v3227_v40, %v822_v39  ;;  %vm838_vm5 = vcmp.ge.f32.partialorder %v3230_v41, %v822_v39  ;;  %vm839_vm6 = vcmp.ge.f32.partialorder %v3240_v50, %v822_v39  ;;  %v866_v30 = vmax.f32 %v865_v32, %v3380_v19 }
 0x29a   : > { %v3387_v31 = vsel %vm837_vm4, -inf, %v3227_v40  ;;  %v3390_v34 = vsel %vm838_vm5, -inf, %v3230_v41  ;;  %vm840_vm7 = vcmp.ge.f32.partialorder %v3253_v55, %v822_v39  ;;  %v3400_v22 = vsel %vm839_vm6, -inf, %v3240_v50 }
 0x29b   : > { %v867_v35 = vmax.f32 %v866_v30, %v3393_v57  ;;  %v870_v14 = vmax.f32 %v3387_v31, %v3390_v34  ;;  %v3413_v32 = vsel %vm840_vm7, -inf, %v3253_v55 }
 0x29c   : > { %v827_v13 = vpop.xlane.xlu0 %826 }
 0x29d   : > { %vm841_vm8 = vcmp.ge.f32.partialorder %v3247_v53, %v827_v13  ;;  %vm842_vm9 = vcmp.ge.f32.partialorder %v3250_v54, %v827_v13  ;;  %vm843_vm10 = vcmp.ge.f32.partialorder %v3260_v3, %v827_v13  ;;  %868 = vmax.xlane.f32.xlu0 %v867_v35  ;;  %v871_v40 = vmax.f32 %v870_v14, %v3400_v22 }
 0x29e   : > { %v3407_v41 = vsel %vm841_vm8, -inf, %v3247_v53  ;;  %v3410_v43 = vsel %vm842_vm9, -inf, %v3250_v54  ;;  %vm844_vm11 = vcmp.ge.f32.partialorder %v3273_v10, %v827_v13  ;;  %v3420_v35 = vsel %vm843_vm10, -inf, %v3260_v3 }
 0x29f   : > { %v872_v50 = vmax.f32 %v871_v40, %v3413_v32  ;;  %v875_v39 = vmax.f32 %v3407_v41, %v3410_v43  ;;  %v3433_v54 = vsel %vm844_vm11, -inf, %v3273_v10 }
 0x2a0   : > { %v832_v30 = vpop.xlane.xlu1 %831 }
 0x2a1   : > { %vm845_vm12 = vcmp.ge.f32.partialorder %v3267_v7, %v832_v30  ;;  %vm846_vm13 = vcmp.ge.f32.partialorder %v3270_v9, %v832_v30  ;;  %vm847_vm14 = vcmp.ge.f32.partialorder %v3280_v24, %v832_v30  ;;  %873 = vmax.xlane.f32.xlu1 %v872_v50  ;;  %v876_v14 = vmax.f32 %v875_v39, %v3420_v35 }
 0x2a2   : > { %v3427_v53 = vsel %vm845_vm12, -inf, %v3267_v7  ;;  %v3430_v13 = vsel %vm846_vm13, -inf, %v3270_v9  ;;  %vm848_vm15 = vcmp.ge.f32.partialorder %v3293_v33, %v832_v30  ;;  %v3440_v40 = vsel %vm847_vm14, -inf, %v3280_v24 }
 0x2a3   : > { %v877_v55 = vmax.f32 %v876_v14, %v3433_v54  ;;  %v880_v3 = vmax.f32 %v3427_v53, %v3430_v13  ;;  %v3447_v10 = vsel %vm848_vm15, -inf, %v3293_v33 }
 0x2a5   : > { %v1271_v50 = vpop.xlane.xlu0 %1270  ;;  %878 = vmax.xlane.f32.xlu0 %v877_v55  ;;  %v881_v7 = vmax.f32 %v880_v3, %v3440_v40 }
 0x2a6   : > { %vm1287_vm0 = vcmp.ge.f32.partialorder %v3287_v28, %v1271_v50  ;;  %vm1288_vm1 = vcmp.ge.f32.partialorder %v3290_v29, %v1271_v50  ;;  %vm1289_vm2 = vcmp.ge.f32.partialorder %v3309_v51, %v1271_v50  ;;  %v1276_v9 = vpop.xlane.xlu1 %1275  ;;  %vm1290_vm6 = vcmp.ge.f32.partialorder %v3319_v6, %v1271_v50 }
 0x2a7   : > { %v3450_v39 = vsel %vm1287_vm0, -inf, %v3287_v28  ;;  %v3453_v24 = vsel %vm1288_vm1, -inf, %v3290_v29  ;;  %vm1291_vm3 = vcmp.ge.f32.partialorder %v3300_v45, %v1276_v9  ;;  %vm1292_vm4 = vcmp.ge.f32.partialorder %v3303_v48, %v1276_v9 }
 0x2a8   : > { %vm1293_vm5 = vcmp.ge.f32.partialorder %v3316_v62, %v1276_v9  ;;  %v3459_v30 = vsel %vm1291_vm3, -inf, %v3300_v45  ;;  %v3462_v14 = vsel %vm1292_vm4, -inf, %v3303_v48  ;;  %v882_v33 = vmax.f32 %v881_v7, %v3447_v10 }
 0x2a9   : > { %v1319_v28 = vmax.f32 %v3450_v39, %v3453_v24  ;;  %v3469_v29 = vsel %vm1289_vm2, -inf, %v3309_v51  ;;  %vm1294_vm7 = vcmp.ge.f32.partialorder %v3324_v25, %v1276_v9  ;;  %v1324_v45 = vmax.f32 %v3459_v30, %v3462_v14 }
 0x2aa   : > { %883 = vmax.xlane.f32.xlu1 %v882_v33  ;;  %v3476_v48 = vsel %vm1293_vm5, -inf, %v3316_v62  ;;  %v3479_v3 = vsel %vm1290_vm6, -inf, %v3319_v6  ;;  %v3484_v51 = vsel %vm1294_vm7, -inf, %v3324_v25 }
 0x2ab   : > { %v1320_v55 = vmax.f32 %v1319_v28, %v3469_v29  ;;  %v1325_v50 = vmax.f32 %v1324_v45, %v3476_v48 }
 0x2ac   : > { %v1281_v7 = vpop.xlane.xlu0 %1280 }
 0x2ad   : > { %v1321_v33 = vmax.f32 %v1320_v55, %v3479_v3  ;;  %vm1295_vm8 = vcmp.ge.f32.partialorder %v3331_v36, %v1281_v7  ;;  %vm1296_vm9 = vcmp.ge.f32.partialorder %v3334_v49, %v1281_v7  ;;  %vm1297_vm10 = vcmp.ge.f32.partialorder %v3349_v21, %v1281_v7 }
 0x2ae   : > { %v1286_v9 = vpop.xlane.xlu1 %1285  ;;  %v1326_v62 = vmax.f32 %v1325_v50, %v3484_v51  ;;  %v3491_v6 = vsel %vm1295_vm8, -inf, %v3331_v36  ;;  %v3494_v28 = vsel %vm1296_vm9, -inf, %v3334_v49  ;;  %vm1298_vm14 = vcmp.ge.f32.partialorder %v3359_v11, %v1281_v7 }
 0x2af   : > { %1322 = vmax.xlane.f32.xlu0 %v1321_v33  ;;  %vm1299_vm11 = vcmp.ge.f32.partialorder %v3340_v61, %v1286_v9  ;;  %vm1300_vm12 = vcmp.ge.f32.partialorder %v3343_v18, %v1286_v9  ;;  %vm1301_vm13 = vcmp.ge.f32.partialorder %v3356_v8, %v1286_v9  ;;  %v1329_v36 = vmax.f32 %v3491_v6, %v3494_v28 }
 0x2b0   : > { %v3500_v25 = vsel %vm1299_vm11, -inf, %v3340_v61  ;;  %v3503_v45 = vsel %vm1300_vm12, -inf, %v3343_v18  ;;  %1327 = vmax.xlane.f32.xlu1 %v1326_v62  ;;  %v3509_v49 = vsel %vm1297_vm10, -inf, %v3349_v21  ;;  %vm1302_vm15 = vcmp.ge.f32.partialorder %v3364_v2, %v1286_v9 }
 0x2b1   : > { %v1334_v55 = vmax.f32 %v3500_v25, %v3503_v45  ;;  %v1330_v61 = vmax.f32 %v1329_v36, %v3509_v49  ;;  %v3516_v50 = vsel %vm1301_vm13, -inf, %v3356_v8  ;;  %v3519_v18 = vsel %vm1298_vm14, -inf, %v3359_v11 }
 0x2b2   : > { %v3524_v21 = vsel %vm1302_vm15, -inf, %v3364_v2 }
 0x2b3   : > { %v1335_v7 = vmax.f32 %v1334_v55, %v3516_v50  ;;  %v1331_v33 = vmax.f32 %v1330_v61, %v3519_v18 }
 0x2b5   : > { %v1336_v9 = vmax.f32 %v1335_v7, %v3524_v21  ;;  %1332 = vmax.xlane.f32.xlu0 %v1331_v33 }
 0x2b7   : > { %1337 = vmax.xlane.f32.xlu1 %v1336_v9 }
 0x32a   : > { %v869_v62 = vpop.xlane.xlu0 %868 }
 0x32b   : > { %vm885_vm0 = vcmp.ge.f32.partialorder %v3371_v58, %v869_v62  ;;  %vm886_vm1 = vcmp.ge.f32.partialorder %v3374_v1, %v869_v62  ;;  %vm887_vm2 = vcmp.ge.f32.partialorder %v3380_v19, %v869_v62  ;;  %vm888_vm3 = vcmp.ge.f32.partialorder %v3393_v57, %v869_v62 }
 0x32c   : > { %v3531_v8 = vsel %vm885_vm0, -inf, %v3371_v58  ;;  %v3534_v11 = vsel %vm886_vm1, -inf, %v3374_v1  ;;  %v3540_v55 = vsel %vm887_vm2, -inf, %v3380_v19  ;;  %v3553_v7 = vsel %vm888_vm3, -inf, %v3393_v57 }
 0x32d   : > { %v917_v2 = vmax.f32 %v3531_v8, %v3534_v11 }
 0x32e   : > { %v874_v36 = vpop.xlane.xlu1 %873 }
 0x32f   : > { %vm889_vm4 = vcmp.ge.f32.partialorder %v3387_v31, %v874_v36  ;;  %vm890_vm5 = vcmp.ge.f32.partialorder %v3390_v34, %v874_v36  ;;  %vm891_vm6 = vcmp.ge.f32.partialorder %v3400_v22, %v874_v36  ;;  %v918_v58 = vmax.f32 %v917_v2, %v3540_v55 }
 0x330   : > { %v3547_v1 = vsel %vm889_vm4, -inf, %v3387_v31  ;;  %v3550_v61 = vsel %vm890_vm5, -inf, %v3390_v34  ;;  %vm892_vm7 = vcmp.ge.f32.partialorder %v3413_v32, %v874_v36  ;;  %v3560_v62 = vsel %vm891_vm6, -inf, %v3400_v22 }
 0x331   : > { %v919_v19 = vmax.f32 %v918_v58, %v3553_v7  ;;  %v922_v33 = vmax.f32 %v3547_v1, %v3550_v61  ;;  %v3573_v2 = vsel %vm892_vm7, -inf, %v3413_v32 }
 0x332   : > { %v879_v9 = vpop.xlane.xlu0 %878 }
 0x333   : > { %vm893_vm8 = vcmp.ge.f32.partialorder %v3407_v41, %v879_v9  ;;  %vm894_vm9 = vcmp.ge.f32.partialorder %v3410_v43, %v879_v9  ;;  %vm895_vm10 = vcmp.ge.f32.partialorder %v3420_v35, %v879_v9  ;;  %920 = vmax.xlane.f32.xlu0 %v919_v19  ;;  %v923_v31 = vmax.f32 %v922_v33, %v3560_v62 }
 0x334   : > { %v3567_v34 = vsel %vm893_vm8, -inf, %v3407_v41  ;;  %v3570_v57 = vsel %vm894_vm9, -inf, %v3410_v43  ;;  %vm896_vm11 = vcmp.ge.f32.partialorder %v3433_v54, %v879_v9  ;;  %v3580_v58 = vsel %vm895_vm10, -inf, %v3420_v35 }
 0x335   : > { %v924_v22 = vmax.f32 %v923_v31, %v3573_v2  ;;  %v927_v36 = vmax.f32 %v3567_v34, %v3570_v57  ;;  %v3587_v43 = vsel %vm896_vm11, -inf, %v3433_v54 }
 0x337   : > { %v884_v19 = vpop.xlane.xlu1 %883  ;;  %925 = vmax.xlane.f32.xlu1 %v924_v22  ;;  %v928_v41 = vmax.f32 %v927_v36, %v3580_v58 }
 0x338   : > { %vm897_vm12 = vcmp.ge.f32.partialorder %v3427_v53, %v884_v19  ;;  %vm898_vm13 = vcmp.ge.f32.partialorder %v3430_v13, %v884_v19  ;;  %vm899_vm14 = vcmp.ge.f32.partialorder %v3440_v40, %v884_v19  ;;  %vm900_vm15 = vcmp.ge.f32.partialorder %v3447_v10, %v884_v19 }
 0x339   : > { %v3590_v32 = vsel %vm897_vm12, -inf, %v3427_v53  ;;  %v3593_v33 = vsel %vm898_vm13, -inf, %v3430_v13  ;;  %v929_v35 = vmax.f32 %v928_v41, %v3587_v43  ;;  %v3600_v31 = vsel %vm899_vm14, -inf, %v3440_v40 }
 0x33a   : > { %v932_v9 = vmax.f32 %v3590_v32, %v3593_v33  ;;  %v3607_v13 = vsel %vm900_vm15, -inf, %v3447_v10 }
 0x33b   : > { %930 = vmax.xlane.f32.xlu0 %v929_v35 }
 0x33c   : > { %v1323_v22 = vpop.xlane.xlu0 %1322  ;;  %v933_v54 = vmax.f32 %v932_v9, %v3600_v31 }
 0x33d   : > { %vm1339_vm0 = vcmp.ge.f32.partialorder %v3450_v39, %v1323_v22  ;;  %vm1340_vm1 = vcmp.ge.f32.partialorder %v3453_v24, %v1323_v22  ;;  %vm1341_vm2 = vcmp.ge.f32.partialorder %v3469_v29, %v1323_v22  ;;  %v1328_v53 = vpop.xlane.xlu1 %1327  ;;  %vm1342_vm6 = vcmp.ge.f32.partialorder %v3479_v3, %v1323_v22 }
 0x33e   : > { %v3610_v36 = vsel %vm1339_vm0, -inf, %v3450_v39  ;;  %v3613_v19 = vsel %vm1340_vm1, -inf, %v3453_v24  ;;  %vm1343_vm3 = vcmp.ge.f32.partialorder %v3459_v30, %v1328_v53  ;;  %vm1344_vm4 = vcmp.ge.f32.partialorder %v3462_v14, %v1328_v53 }
 0x33f   : > { %vm1345_vm5 = vcmp.ge.f32.partialorder %v3476_v48, %v1328_v53  ;;  %v3619_v40 = vsel %vm1343_vm3, -inf, %v3459_v30  ;;  %v3622_v41 = vsel %vm1344_vm4, -inf, %v3462_v14  ;;  %v934_v10 = vmax.f32 %v933_v54, %v3607_v13 }
 0x340   : > { %v1371_v39 = vmax.f32 %v3610_v36, %v3613_v19  ;;  %v3629_v24 = vsel %vm1341_vm2, -inf, %v3469_v29  ;;  %vm1346_vm7 = vcmp.ge.f32.partialorder %v3484_v51, %v1328_v53  ;;  %v1376_v30 = vmax.f32 %v3619_v40, %v3622_v41 }
 0x341   : > { %935 = vmax.xlane.f32.xlu1 %v934_v10  ;;  %v3636_v14 = vsel %vm1345_vm5, -inf, %v3476_v48  ;;  %v3639_v9 = vsel %vm1342_vm6, -inf, %v3479_v3  ;;  %v3644_v29 = vsel %vm1346_vm7, -inf, %v3484_v51 }
 0x342   : > { %v1372_v35 = vmax.f32 %v1371_v39, %v3629_v24  ;;  %v1377_v22 = vmax.f32 %v1376_v30, %v3636_v14  ;;  %v1333_v54 = vpop.xlane.xlu0 %1332 }
 0x343   : > { %vm1347_vm8 = vcmp.ge.f32.partialorder %v3491_v6, %v1333_v54  ;;  %vm1348_vm9 = vcmp.ge.f32.partialorder %v3494_v28, %v1333_v54  ;;  %vm1349_vm10 = vcmp.ge.f32.partialorder %v3509_v49, %v1333_v54  ;;  %vm1350_vm14 = vcmp.ge.f32.partialorder %v3519_v18, %v1333_v54 }
 0x344   : > { %v1373_v10 = vmax.f32 %v1372_v35, %v3639_v9  ;;  %v1338_v53 = vpop.xlane.xlu1 %1337  ;;  %v1378_v48 = vmax.f32 %v1377_v22, %v3644_v29  ;;  %v3651_v3 = vsel %vm1347_vm8, -inf, %v3491_v6  ;;  %v3654_v39 = vsel %vm1348_vm9, -inf, %v3494_v28 }
 0x345   : > { %vm1351_vm11 = vcmp.ge.f32.partialorder %v3500_v25, %v1338_v53  ;;  %vm1352_vm12 = vcmp.ge.f32.partialorder %v3503_v45, %v1338_v53  ;;  %vm1353_vm13 = vcmp.ge.f32.partialorder %v3516_v50, %v1338_v53  ;;  %v1381_v6 = vmax.f32 %v3651_v3, %v3654_v39 }
 0x346   : > { %1374 = vmax.xlane.f32.xlu0 %v1373_v10  ;;  %v3660_v51 = vsel %vm1351_vm11, -inf, %v3500_v25  ;;  %v3663_v30 = vsel %vm1352_vm12, -inf, %v3503_v45  ;;  %1379 = vmax.xlane.f32.xlu1 %v1378_v48  ;;  %v3669_v28 = vsel %vm1349_vm10, -inf, %v3509_v49  ;;  %vm1354_vm15 = vcmp.ge.f32.partialorder %v3524_v21, %v1338_v53 }
 0x347   : > { %v1386_v35 = vmax.f32 %v3660_v51, %v3663_v30  ;;  %v1382_v25 = vmax.f32 %v1381_v6, %v3669_v28  ;;  %v3676_v22 = vsel %vm1353_vm13, -inf, %v3516_v50  ;;  %v3679_v45 = vsel %vm1350_vm14, -inf, %v3519_v18 }
 0x348   : > { %v3684_v49 = vsel %vm1354_vm15, -inf, %v3524_v21 }
 0x349   : > { %v1387_v54 = vmax.f32 %v1386_v35, %v3676_v22  ;;  %v1383_v10 = vmax.f32 %v1382_v25, %v3679_v45 }
 0x34b   : > { %v1388_v53 = vmax.f32 %v1387_v54, %v3684_v49  ;;  %1384 = vmax.xlane.f32.xlu0 %v1383_v10 }
 0x34d   : > { %1389 = vmax.xlane.f32.xlu1 %v1388_v53 }
 0x3c0   : > { %v921_v48 = vpop.xlane.xlu0 %920 }
 0x3c1   : > { %vm937_vm0 = vcmp.ge.f32.partialorder %v3531_v8, %v921_v48  ;;  %vm938_vm1 = vcmp.ge.f32.partialorder %v3534_v11, %v921_v48  ;;  %vm939_vm2 = vcmp.ge.f32.partialorder %v3540_v55, %v921_v48  ;;  %vm940_vm3 = vcmp.ge.f32.partialorder %v3553_v7, %v921_v48 }
 0x3c2   : > { %v3691_v50 = vsel %vm937_vm0, -inf, %v3531_v8  ;;  %v3694_v18 = vsel %vm938_vm1, -inf, %v3534_v11  ;;  %v3700_v35 = vsel %vm939_vm2, -inf, %v3540_v55  ;;  %v3713_v54 = vsel %vm940_vm3, -inf, %v3553_v7 }
 0x3c3   : > { %v969_v21 = vmax.f32 %v3691_v50, %v3694_v18 }
 0x3c4   : > { %v926_v6 = vpop.xlane.xlu1 %925 }
 0x3c5   : > { %vm941_vm4 = vcmp.ge.f32.partialorder %v3547_v1, %v926_v6  ;;  %vm942_vm5 = vcmp.ge.f32.partialorder %v3550_v61, %v926_v6  ;;  %vm943_vm6 = vcmp.ge.f32.partialorder %v3560_v62, %v926_v6  ;;  %v970_v8 = vmax.f32 %v969_v21, %v3700_v35 }
 0x3c6   : > { %v3707_v11 = vsel %vm941_vm4, -inf, %v3547_v1  ;;  %v3710_v25 = vsel %vm942_vm5, -inf, %v3550_v61  ;;  %vm944_vm7 = vcmp.ge.f32.partialorder %v3573_v2, %v926_v6  ;;  %v3720_v48 = vsel %vm943_vm6, -inf, %v3560_v62 }
 0x3c7   : > { %v971_v55 = vmax.f32 %v970_v8, %v3713_v54  ;;  %v974_v10 = vmax.f32 %v3707_v11, %v3710_v25  ;;  %v3733_v21 = vsel %vm944_vm7, -inf, %v3573_v2 }
 0x3c8   : > { %v931_v53 = vpop.xlane.xlu0 %930 }
 0x3c9   : > { %vm945_vm8 = vcmp.ge.f32.partialorder %v3567_v34, %v931_v53  ;;  %vm946_vm9 = vcmp.ge.f32.partialorder %v3570_v57, %v931_v53  ;;  %vm947_vm10 = vcmp.ge.f32.partialorder %v3580_v58, %v931_v53  ;;  %972 = vmax.xlane.f32.xlu0 %v971_v55  ;;  %v975_v1 = vmax.f32 %v974_v10, %v3720_v48 }
 0x3ca   : > { %v3727_v61 = vsel %vm945_vm8, -inf, %v3567_v34  ;;  %v3730_v7 = vsel %vm946_vm9, -inf, %v3570_v57  ;;  %vm948_vm11 = vcmp.ge.f32.partialorder %v3587_v43, %v931_v53  ;;  %v3740_v8 = vsel %vm947_vm10, -inf, %v3580_v58 }
 0x3cb   : > { %v976_v62 = vmax.f32 %v975_v1, %v3733_v21  ;;  %v979_v6 = vmax.f32 %v3727_v61, %v3730_v7  ;;  %v3744_v57 = vsel %vm948_vm11, -inf, %v3587_v43 }
 0x3cd   : > { %977 = vmax.xlane.f32.xlu1 %v976_v62  ;;  %v980_v34 = vmax.f32 %v979_v6, %v3740_v8 }
 0x3ce   : > { %v936_v55 = vpop.xlane.xlu1 %935 }
 0x3cf   : > { %vm949_vm12 = vcmp.ge.f32.partialorder %v3590_v32, %v936_v55  ;;  %vm950_vm13 = vcmp.ge.f32.partialorder %v3593_v33, %v936_v55  ;;  %vm951_vm14 = vcmp.ge.f32.partialorder %v3600_v31, %v936_v55  ;;  %v981_v2 = vmax.f32 %v980_v34, %v3744_v57 }
 0x3d0   : > { %v3751_v10 = vsel %vm949_vm12, -inf, %v3590_v32  ;;  %v3754_v58 = vsel %vm950_vm13, -inf, %v3593_v33  ;;  %vm952_vm15 = vcmp.ge.f32.partialorder %v3607_v13, %v936_v55  ;;  %v3760_v53 = vsel %vm951_vm14, -inf, %v3600_v31 }
 0x3d1   : > { %982 = vmax.xlane.f32.xlu0 %v981_v2  ;;  %v984_v43 = vmax.f32 %v3751_v10, %v3754_v58  ;;  %v3767_v33 = vsel %vm952_vm15, -inf, %v3607_v13 }
 0x3d3   : > { %v1375_v1 = vpop.xlane.xlu0 %1374  ;;  %v985_v62 = vmax.f32 %v984_v43, %v3760_v53  ;;  %v1380_v32 = vpop.xlane.xlu1 %1379 }
 0x3d4   : > { %vm1391_vm0 = vcmp.ge.f32.partialorder %v3610_v36, %v1375_v1  ;;  %vm1392_vm1 = vcmp.ge.f32.partialorder %v3613_v19, %v1375_v1  ;;  %vm1393_vm2 = vcmp.ge.f32.partialorder %v3629_v24, %v1375_v1  ;;  %vm1395_vm3 = vcmp.ge.f32.partialorder %v3619_v40, %v1380_v32 }
 0x3d5   : > { %v3770_v6 = vsel %vm1391_vm0, -inf, %v3610_v36  ;;  %v3773_v34 = vsel %vm1392_vm1, -inf, %v3613_v19  ;;  %vm1396_vm4 = vcmp.ge.f32.partialorder %v3622_v41, %v1380_v32  ;;  %vm1397_vm5 = vcmp.ge.f32.partialorder %v3636_v14, %v1380_v32 }
 0x3d6   : > { %v3779_v31 = vsel %vm1395_vm3, -inf, %v3619_v40  ;;  %v3782_v55 = vsel %vm1396_vm4, -inf, %v3622_v41  ;;  %v986_v13 = vmax.f32 %v985_v62, %v3767_v33  ;;  %vm1394_vm6 = vcmp.ge.f32.partialorder %v3639_v9, %v1375_v1 }
 0x3d7   : > { %v1423_v36 = vmax.f32 %v3770_v6, %v3773_v34  ;;  %v3789_v19 = vsel %vm1393_vm2, -inf, %v3629_v24  ;;  %vm1398_vm7 = vcmp.ge.f32.partialorder %v3644_v29, %v1380_v32  ;;  %v1428_v40 = vmax.f32 %v3779_v31, %v3782_v55 }
 0x3d8   : > { %987 = vmax.xlane.f32.xlu1 %v986_v13  ;;  %v3796_v41 = vsel %vm1397_vm5, -inf, %v3636_v14  ;;  %v3799_v43 = vsel %vm1394_vm6, -inf, %v3639_v9  ;;  %v1385_v62 = vpop.xlane.xlu0 %1384  ;;  %v3804_v24 = vsel %vm1398_vm7, -inf, %v3644_v29 }
 0x3d9   : > { %v1424_v2 = vmax.f32 %v1423_v36, %v3789_v19  ;;  %v1429_v1 = vmax.f32 %v1428_v40, %v3796_v41  ;;  %vm1399_vm8 = vcmp.ge.f32.partialorder %v3651_v3, %v1385_v62  ;;  %vm1400_vm9 = vcmp.ge.f32.partialorder %v3654_v39, %v1385_v62 }
 0x3da   : > { %vm1401_vm10 = vcmp.ge.f32.partialorder %v3669_v28, %v1385_v62  ;;  %v1390_v32 = vpop.xlane.xlu1 %1389  ;;  %v3811_v9 = vsel %vm1399_vm8, -inf, %v3651_v3  ;;  %v3814_v36 = vsel %vm1400_vm9, -inf, %v3654_v39  ;;  %vm1402_vm14 = vcmp.ge.f32.partialorder %v3679_v45, %v1385_v62 }
 0x3db   : > { %v1425_v13 = vmax.f32 %v1424_v2, %v3799_v43  ;;  %v1430_v14 = vmax.f32 %v1429_v1, %v3804_v24  ;;  %vm1403_vm11 = vcmp.ge.f32.partialorder %v3660_v51, %v1390_v32  ;;  %vm1404_vm12 = vcmp.ge.f32.partialorder %v3663_v30, %v1390_v32 }
 0x3dc   : > { %vm1405_vm13 = vcmp.ge.f32.partialorder %v3676_v22, %v1390_v32  ;;  %v3820_v29 = vsel %vm1403_vm11, -inf, %v3660_v51  ;;  %v3823_v40 = vsel %vm1404_vm12, -inf, %v3663_v30  ;;  %v1433_v3 = vmax.f32 %v3811_v9, %v3814_v36 }
 0x3dd   : > { %1426 = vmax.xlane.f32.xlu0 %v1425_v13  ;;  %1431 = vmax.xlane.f32.xlu1 %v1430_v14  ;;  %v3829_v39 = vsel %vm1401_vm10, -inf, %v3669_v28  ;;  %vm1406_vm15 = vcmp.ge.f32.partialorder %v3684_v49, %v1390_v32  ;;  %v1438_v2 = vmax.f32 %v3820_v29, %v3823_v40  ;;  %v3836_v1 = vsel %vm1405_vm13, -inf, %v3676_v22 }
 0x3de   : > { %v1434_v51 = vmax.f32 %v1433_v3, %v3829_v39  ;;  %v3839_v30 = vsel %vm1402_vm14, -inf, %v3679_v45  ;;  %v3844_v28 = vsel %vm1406_vm15, -inf, %v3684_v49 }
 0x3df   : > { %v1439_v62 = vmax.f32 %v1438_v2, %v3836_v1 }
 0x3e0   : > { %v1435_v13 = vmax.f32 %v1434_v51, %v3839_v30 }
 0x3e1   : > { %v1440_v32 = vmax.f32 %v1439_v62, %v3844_v28 }
 0x3e2   : > { %1436 = vmax.xlane.f32.xlu0 %v1435_v13 }
 0x3e3   : > { %1441 = vmax.xlane.f32.xlu1 %v1440_v32 }
 0x456   : > { %v973_v14 = vpop.xlane.xlu0 %972 }
 0x457   : > { %vm989_vm0 = vcmp.ge.f32.partialorder %v3691_v50, %v973_v14  ;;  %vm990_vm1 = vcmp.ge.f32.partialorder %v3694_v18, %v973_v14  ;;  %vm991_vm2 = vcmp.ge.f32.partialorder %v3700_v35, %v973_v14  ;;  %vm992_vm3 = vcmp.ge.f32.partialorder %v3713_v54, %v973_v14 }
 0x458   : > { %v3851_v22 = vsel %vm989_vm0, -inf, %v3691_v50  ;;  %v3854_v45 = vsel %vm990_vm1, -inf, %v3694_v18  ;;  %v3860_v2 = vsel %vm991_vm2, -inf, %v3700_v35  ;;  %v3873_v62 = vsel %vm992_vm3, -inf, %v3713_v54 }
 0x459   : > { %v1021_v49 = vmax.f32 %v3851_v22, %v3854_v45 }
 0x45a   : > { %v978_v3 = vpop.xlane.xlu1 %977 }
 0x45b   : > { %vm993_vm4 = vcmp.ge.f32.partialorder %v3707_v11, %v978_v3  ;;  %vm994_vm5 = vcmp.ge.f32.partialorder %v3710_v25, %v978_v3  ;;  %vm995_vm6 = vcmp.ge.f32.partialorder %v3720_v48, %v978_v3  ;;  %v1022_v50 = vmax.f32 %v1021_v49, %v3860_v2 }
 0x45c   : > { %v3867_v18 = vsel %vm993_vm4, -inf, %v3707_v11  ;;  %v3870_v51 = vsel %vm994_vm5, -inf, %v3710_v25  ;;  %vm996_vm7 = vcmp.ge.f32.partialorder %v3733_v21, %v978_v3  ;;  %v3880_v14 = vsel %vm995_vm6, -inf, %v3720_v48 }
 0x45d   : > { %v1023_v35 = vmax.f32 %v1022_v50, %v3873_v62  ;;  %v1026_v13 = vmax.f32 %v3867_v18, %v3870_v51  ;;  %v3893_v49 = vsel %vm996_vm7, -inf, %v3733_v21 }
 0x45e   : > { %v983_v32 = vpop.xlane.xlu0 %982 }
 0x45f   : > { %vm997_vm8 = vcmp.ge.f32.partialorder %v3727_v61, %v983_v32  ;;  %vm998_vm9 = vcmp.ge.f32.partialorder %v3730_v7, %v983_v32  ;;  %vm999_vm10 = vcmp.ge.f32.partialorder %v3740_v8, %v983_v32  ;;  %1024 = vmax.xlane.f32.xlu0 %v1023_v35  ;;  %v1027_v11 = vmax.f32 %v1026_v13, %v3880_v14 }
 0x460   : > { %v3887_v25 = vsel %vm997_vm8, -inf, %v3727_v61  ;;  %v3890_v54 = vsel %vm998_vm9, -inf, %v3730_v7  ;;  %vm1000_vm11 = vcmp.ge.f32.partialorder %v3744_v57, %v983_v32  ;;  %v3900_v50 = vsel %vm999_vm10, -inf, %v3740_v8 }
 0x461   : > { %v1028_v48 = vmax.f32 %v1027_v11, %v3893_v49  ;;  %v1031_v3 = vmax.f32 %v3887_v25, %v3890_v54  ;;  %v3904_v35 = vsel %vm1000_vm11, -inf, %v3744_v57 }
 0x463   : > { %1029 = vmax.xlane.f32.xlu1 %v1028_v48  ;;  %v1032_v61 = vmax.f32 %v1031_v3, %v3900_v50 }
 0x465   : > { %v988_v7 = vpop.xlane.xlu1 %987  ;;  %v1033_v21 = vmax.f32 %v1032_v61, %v3904_v35 }
 0x466   : > { %vm1001_vm12 = vcmp.ge.f32.partialorder %v3751_v10, %v988_v7  ;;  %vm1002_vm13 = vcmp.ge.f32.partialorder %v3754_v58, %v988_v7  ;;  %vm1003_vm14 = vcmp.ge.f32.partialorder %v3760_v53, %v988_v7  ;;  %vm1004_vm15 = vcmp.ge.f32.partialorder %v3767_v33, %v988_v7 }
 0x467   : > { %v3911_v13 = vsel %vm1001_vm12, -inf, %v3751_v10  ;;  %v3914_v8 = vsel %vm1002_vm13, -inf, %v3754_v58  ;;  %1034 = vmax.xlane.f32.xlu0 %v1033_v21  ;;  %v3920_v32 = vsel %vm1003_vm14, -inf, %v3760_v53  ;;  %v3927_v58 = vsel %vm1004_vm15, -inf, %v3767_v33 }
 0x468   : > { %v1036_v57 = vmax.f32 %v3911_v13, %v3914_v8 }
 0x46a   : > { %v1427_v11 = vpop.xlane.xlu0 %1426  ;;  %v1037_v48 = vmax.f32 %v1036_v57, %v3920_v32  ;;  %v1432_v10 = vpop.xlane.xlu1 %1431 }
 0x46b   : > { %vm1443_vm0 = vcmp.ge.f32.partialorder %v3770_v6, %v1427_v11  ;;  %vm1444_vm1 = vcmp.ge.f32.partialorder %v3773_v34, %v1427_v11  ;;  %vm1445_vm2 = vcmp.ge.f32.partialorder %v3789_v19, %v1427_v11  ;;  %vm1447_vm3 = vcmp.ge.f32.partialorder %v3779_v31, %v1432_v10 }
 0x46c   : > { %v3930_v3 = vsel %vm1443_vm0, -inf, %v3770_v6  ;;  %v3933_v61 = vsel %vm1444_vm1, -inf, %v3773_v34  ;;  %vm1448_vm4 = vcmp.ge.f32.partialorder %v3782_v55, %v1432_v10  ;;  %vm1449_vm5 = vcmp.ge.f32.partialorder %v3796_v41, %v1432_v10 }
 0x46d   : > { %v3939_v53 = vsel %vm1447_vm3, -inf, %v3779_v31  ;;  %v3942_v7 = vsel %vm1448_vm4, -inf, %v3782_v55  ;;  %v1038_v33 = vmax.f32 %v1037_v48, %v3927_v58  ;;  %vm1446_vm6 = vcmp.ge.f32.partialorder %v3799_v43, %v1427_v11 }
 0x46e   : > { %v1475_v6 = vmax.f32 %v3930_v3, %v3933_v61  ;;  %v3949_v34 = vsel %vm1445_vm2, -inf, %v3789_v19  ;;  %vm1450_vm7 = vcmp.ge.f32.partialorder %v3804_v24, %v1432_v10  ;;  %v1480_v31 = vmax.f32 %v3939_v53, %v3942_v7 }
 0x46f   : > { %1039 = vmax.xlane.f32.xlu1 %v1038_v33  ;;  %v3956_v55 = vsel %vm1449_vm5, -inf, %v3796_v41  ;;  %v3959_v57 = vsel %vm1446_vm6, -inf, %v3799_v43  ;;  %v1437_v48 = vpop.xlane.xlu0 %1436  ;;  %v3964_v19 = vsel %vm1450_vm7, -inf, %v3804_v24 }
 0x470   : > { %v1476_v21 = vmax.f32 %v1475_v6, %v3949_v34  ;;  %v1481_v11 = vmax.f32 %v1480_v31, %v3956_v55  ;;  %vm1451_vm8 = vcmp.ge.f32.partialorder %v3811_v9, %v1437_v48  ;;  %vm1452_vm9 = vcmp.ge.f32.partialorder %v3814_v36, %v1437_v48  ;;  %v1442_v10 = vpop.xlane.xlu1 %1441 }
 0x471   : > { %vm1453_vm10 = vcmp.ge.f32.partialorder %v3829_v39, %v1437_v48  ;;  %v3971_v43 = vsel %vm1451_vm8, -inf, %v3811_v9  ;;  %v3974_v6 = vsel %vm1452_vm9, -inf, %v3814_v36  ;;  %vm1455_vm11 = vcmp.ge.f32.partialorder %v3820_v29, %v1442_v10 }
 0x472   : > { %v1477_v33 = vmax.f32 %v1476_v21, %v3959_v57  ;;  %v1482_v41 = vmax.f32 %v1481_v11, %v3964_v19  ;;  %vm1456_vm12 = vcmp.ge.f32.partialorder %v3823_v40, %v1442_v10  ;;  %vm1457_vm13 = vcmp.ge.f32.partialorder %v3836_v1, %v1442_v10 }
 0x473   : > { %v3980_v24 = vsel %vm1455_vm11, -inf, %v3820_v29  ;;  %v3983_v31 = vsel %vm1456_vm12, -inf, %v3823_v40  ;;  %vm1454_vm14 = vcmp.ge.f32.partialorder %v3839_v30, %v1437_v48  ;;  %v1485_v9 = vmax.f32 %v3971_v43, %v3974_v6 }
 0x474   : > { %1478 = vmax.xlane.f32.xlu0 %v1477_v33  ;;  %1483 = vmax.xlane.f32.xlu1 %v1482_v41  ;;  %v3989_v36 = vsel %vm1453_vm10, -inf, %v3829_v39  ;;  %vm1458_vm15 = vcmp.ge.f32.partialorder %v3844_v28, %v1442_v10  ;;  %v1490_v21 = vmax.f32 %v3980_v24, %v3983_v31  ;;  %v3996_v11 = vsel %vm1457_vm13, -inf, %v3836_v1 }
 0x475   : > { %v1486_v29 = vmax.f32 %v1485_v9, %v3989_v36  ;;  %v3999_v40 = vsel %vm1454_vm14, -inf, %v3839_v30  ;;  %v4004_v39 = vsel %vm1458_vm15, -inf, %v3844_v28 }
 0x476   : > { %v1491_v48 = vmax.f32 %v1490_v21, %v3996_v11 }
 0x477   : > { %v1487_v33 = vmax.f32 %v1486_v29, %v3999_v40 }
 0x478   : > { %v1492_v10 = vmax.f32 %v1491_v48, %v4004_v39 }
 0x479   : > { %1488 = vmax.xlane.f32.xlu0 %v1487_v33 }
 0x47a   : > { %1493 = vmax.xlane.f32.xlu1 %v1492_v10 }
 0x4ec   : > { %v1025_v41 = vpop.xlane.xlu0 %1024 }
 0x4ed   : > { %vm1041_vm0 = vcmp.ge.f32.partialorder %v3851_v22, %v1025_v41  ;;  %vm1042_vm1 = vcmp.ge.f32.partialorder %v3854_v45, %v1025_v41  ;;  %vm1043_vm2 = vcmp.ge.f32.partialorder %v3860_v2, %v1025_v41  ;;  %vm1044_vm3 = vcmp.ge.f32.partialorder %v3873_v62, %v1025_v41 }
 0x4ee   : > { %v4011_v1 = vsel %vm1041_vm0, -inf, %v3851_v22  ;;  %v4014_v30 = vsel %vm1042_vm1, -inf, %v3854_v45  ;;  %v4020_v21 = vsel %vm1043_vm2, -inf, %v3860_v2  ;;  %v4033_v48 = vsel %vm1044_vm3, -inf, %v3873_v62 }
 0x4ef   : > { %v1073_v28 = vmax.f32 %v4011_v1, %v4014_v30 }
 0x4f0   : > { %v1030_v9 = vpop.xlane.xlu1 %1029 }
 0x4f1   : > { %vm1045_vm4 = vcmp.ge.f32.partialorder %v3867_v18, %v1030_v9  ;;  %vm1046_vm5 = vcmp.ge.f32.partialorder %v3870_v51, %v1030_v9  ;;  %vm1047_vm6 = vcmp.ge.f32.partialorder %v3880_v14, %v1030_v9  ;;  %v1074_v22 = vmax.f32 %v1073_v28, %v4020_v21 }
 0x4f2   : > { %v4027_v45 = vsel %vm1045_vm4, -inf, %v3867_v18  ;;  %v4030_v29 = vsel %vm1046_vm5, -inf, %v3870_v51  ;;  %vm1048_vm7 = vcmp.ge.f32.partialorder %v3893_v49, %v1030_v9  ;;  %v4040_v41 = vsel %vm1047_vm6, -inf, %v3880_v14 }
 0x4f3   : > { %v1075_v2 = vmax.f32 %v1074_v22, %v4033_v48  ;;  %v1078_v33 = vmax.f32 %v4027_v45, %v4030_v29  ;;  %v4053_v28 = vsel %vm1048_vm7, -inf, %v3893_v49 }
 0x4f4   : > { %v1035_v10 = vpop.xlane.xlu0 %1034 }
 0x4f5   : > { %vm1049_vm8 = vcmp.ge.f32.partialorder %v3887_v25, %v1035_v10  ;;  %vm1050_vm9 = vcmp.ge.f32.partialorder %v3890_v54, %v1035_v10  ;;  %vm1051_vm10 = vcmp.ge.f32.partialorder %v3900_v50, %v1035_v10  ;;  %1076 = vmax.xlane.f32.xlu0 %v1075_v2  ;;  %v1079_v18 = vmax.f32 %v1078_v33, %v4040_v41 }
 0x4f6   : > { %v4047_v51 = vsel %vm1049_vm8, -inf, %v3887_v25  ;;  %v4050_v62 = vsel %vm1050_vm9, -inf, %v3890_v54  ;;  %vm1052_vm11 = vcmp.ge.f32.partialorder %v3904_v35, %v1035_v10  ;;  %v4060_v22 = vsel %vm1051_vm10, -inf, %v3900_v50 }
 0x4f7   : > { %v1080_v14 = vmax.f32 %v1079_v18, %v4053_v28  ;;  %v1083_v9 = vmax.f32 %v4047_v51, %v4050_v62  ;;  %v4064_v2 = vsel %vm1052_vm11, -inf, %v3904_v35 }
 0x4f9   : > { %1081 = vmax.xlane.f32.xlu1 %v1080_v14  ;;  %v1084_v25 = vmax.f32 %v1083_v9, %v4060_v22 }
 0x4fb   : > { %v1085_v54 = vmax.f32 %v1084_v25, %v4064_v2 }
 0x4fc   : > { %v1040_v49 = vpop.xlane.xlu1 %1039 }
 0x4fd   : > { %vm1053_vm12 = vcmp.ge.f32.partialorder %v3911_v13, %v1040_v49  ;;  %vm1054_vm13 = vcmp.ge.f32.partialorder %v3914_v8, %v1040_v49  ;;  %vm1055_vm14 = vcmp.ge.f32.partialorder %v3920_v32, %v1040_v49  ;;  %1086 = vmax.xlane.f32.xlu0 %v1085_v54  ;;  %vm1056_vm15 = vcmp.ge.f32.partialorder %v3927_v58, %v1040_v49 }
 0x4fe   : > { %v4071_v33 = vsel %vm1053_vm12, -inf, %v3911_v13  ;;  %v4074_v50 = vsel %vm1054_vm13, -inf, %v3914_v8  ;;  %v4080_v10 = vsel %vm1055_vm14, -inf, %v3920_v32  ;;  %v4087_v8 = vsel %vm1056_vm15, -inf, %v3927_v58 }
 0x4ff   : > { %v1088_v35 = vmax.f32 %v4071_v33, %v4074_v50 }
 0x501   : > { %v1479_v18 = vpop.xlane.xlu0 %1478  ;;  %v1089_v14 = vmax.f32 %v1088_v35, %v4080_v10  ;;  %v1484_v13 = vpop.xlane.xlu1 %1483 }
 0x502   : > { %vm1495_vm0 = vcmp.ge.f32.partialorder %v3930_v3, %v1479_v18  ;;  %vm1496_vm1 = vcmp.ge.f32.partialorder %v3933_v61, %v1479_v18  ;;  %vm1497_vm2 = vcmp.ge.f32.partialorder %v3949_v34, %v1479_v18  ;;  %vm1499_vm3 = vcmp.ge.f32.partialorder %v3939_v53, %v1484_v13 }
 0x503   : > { %v4090_v9 = vsel %vm1495_vm0, -inf, %v3930_v3  ;;  %v4093_v25 = vsel %vm1496_vm1, -inf, %v3933_v61  ;;  %vm1500_vm4 = vcmp.ge.f32.partialorder %v3942_v7, %v1484_v13  ;;  %vm1501_vm5 = vcmp.ge.f32.partialorder %v3956_v55, %v1484_v13 }
 0x504   : > { %v4099_v32 = vsel %vm1499_vm3, -inf, %v3939_v53  ;;  %v4102_v54 = vsel %vm1500_vm4, -inf, %v3942_v7  ;;  %v1090_v58 = vmax.f32 %v1089_v14, %v4087_v8  ;;  %vm1498_vm6 = vcmp.ge.f32.partialorder %v3959_v57, %v1479_v18 }
 0x505   : > { %v1527_v3 = vmax.f32 %v4090_v9, %v4093_v25  ;;  %v4109_v61 = vsel %vm1497_vm2, -inf, %v3949_v34  ;;  %vm1502_vm7 = vcmp.ge.f32.partialorder %v3964_v19, %v1484_v13  ;;  %v1532_v53 = vmax.f32 %v4099_v32, %v4102_v54 }
 0x506   : > { %1091 = vmax.xlane.f32.xlu1 %v1090_v58  ;;  %v4116_v7 = vsel %vm1501_vm5, -inf, %v3956_v55  ;;  %v4119_v35 = vsel %vm1498_vm6, -inf, %v3959_v57  ;;  %v1489_v14 = vpop.xlane.xlu0 %1488  ;;  %v4124_v34 = vsel %vm1502_vm7, -inf, %v3964_v19 }
 0x507   : > { %v1528_v49 = vmax.f32 %v1527_v3, %v4109_v61  ;;  %v1533_v18 = vmax.f32 %v1532_v53, %v4116_v7  ;;  %vm1503_vm8 = vcmp.ge.f32.partialorder %v3971_v43, %v1489_v14  ;;  %vm1504_vm9 = vcmp.ge.f32.partialorder %v3974_v6, %v1489_v14  ;;  %v1494_v13 = vpop.xlane.xlu1 %1493 }
 0x508   : > { %vm1505_vm10 = vcmp.ge.f32.partialorder %v3989_v36, %v1489_v14  ;;  %v4131_v57 = vsel %vm1503_vm8, -inf, %v3971_v43  ;;  %v4134_v3 = vsel %vm1504_vm9, -inf, %v3974_v6  ;;  %vm1507_vm11 = vcmp.ge.f32.partialorder %v3980_v24, %v1494_v13 }
 0x509   : > { %v1529_v58 = vmax.f32 %v1528_v49, %v4119_v35  ;;  %v1534_v55 = vmax.f32 %v1533_v18, %v4124_v34  ;;  %vm1508_vm12 = vcmp.ge.f32.partialorder %v3983_v31, %v1494_v13  ;;  %vm1509_vm13 = vcmp.ge.f32.partialorder %v3996_v11, %v1494_v13 }
 0x50a   : > { %v4140_v19 = vsel %vm1507_vm11, -inf, %v3980_v24  ;;  %v4143_v53 = vsel %vm1508_vm12, -inf, %v3983_v31  ;;  %vm1506_vm14 = vcmp.ge.f32.partialorder %v3999_v40, %v1489_v14  ;;  %v1537_v43 = vmax.f32 %v4131_v57, %v4134_v3 }
 0x50b   : > { %1530 = vmax.xlane.f32.xlu0 %v1529_v58  ;;  %1535 = vmax.xlane.f32.xlu1 %v1534_v55  ;;  %v4149_v6 = vsel %vm1505_vm10, -inf, %v3989_v36  ;;  %vm1510_vm15 = vcmp.ge.f32.partialorder %v4004_v39, %v1494_v13  ;;  %v1542_v49 = vmax.f32 %v4140_v19, %v4143_v53  ;;  %v4156_v18 = vsel %vm1509_vm13, -inf, %v3996_v11  ;;  %v2632_v55 = vld [vmem:[#allocation9 + $0x40] sm:$0xff]   ;;  %v2636_v11 = vld [vmem:[#allocation9 + $0x48] sm:$0xff]  }
 0x50c   : > { %v1538_v24 = vmax.f32 %v1537_v43, %v4149_v6  ;;  %v4159_v31 = vsel %vm1506_vm14, -inf, %v3999_v40  ;;  %v4164_v36 = vsel %vm1510_vm15, -inf, %v4004_v39  ;;  %v2634_v43 = vld [vmem:[#allocation9 + $0xc0] sm:$0xff]   ;;  %2423 = vmatprep.subr.bf16.mxu0 %v2632_v55  ;;  %v2638_v40 = vld [vmem:[#allocation9 + $0xc8] sm:$0xff]   ;;  %v2640_v39 = vld [vmem:[#allocation9 + $0x50] sm:$0xff]  }
 0x50d   : > { %v1543_v14 = vmax.f32 %v1542_v49, %v4156_v18  ;;  %2463 = vmatprep.subr.bf16.mxu1 %v2634_v43  ;;  %2424 = vmatpush3.bf16.msra.mxu0 %v2633_v47  ;;  %v2637_v49 = vld [vmem:[#allocation9 + $0x8] sm:$0xff]   ;;  %v2645_v55 = vld [vmem:[#allocation9 + $0x18] sm:$0xff]   ;;  %v2650_v47 = vld [vmem:[#allocation9 + $0xe0] sm:$0xff]  }
 0x50e   : > { %v1539_v58 = vmax.f32 %v1538_v24, %v4159_v31  ;;  %2464 = vmatpush3.bf16.msra.mxu1 %v2635_v42  ;;  %2425 = vmatprep.subr.bf16.mxu0 %v2636_v11  ;;  %v2642_v24 = vld [vmem:[#allocation9 + $0xd0] sm:$0xff]   ;;  %v2647_v43 = vld [vmem:[#allocation9 + $0x98] sm:$0xff]   ;;  %v2648_v42 = vld [vmem:[#allocation9 + $0x60] sm:$0xff]  }
 0x50f   : > { %v1544_v13 = vmax.f32 %v1543_v14, %v4164_v36  ;;  %2465 = vmatprep.subr.bf16.mxu1 %v2638_v40  ;;  %v2641_v14 = vld [vmem:[#allocation9 + $0x10] sm:$0xff]   ;;  %v2649_v11 = vld [vmem:[#allocation9 + $0x20] sm:$0xff]  }
 0x510   : > { %1540 = vmax.xlane.f32.xlu0 %v1539_v58  ;;  %v2643_v58 = vld [vmem:[#allocation9 + $0x90] sm:$0xff]   ;;  %v2651_v40 = vld [vmem:[#allocation9 + $0xa0] sm:$0xff]  }
 0x511   : > { %1545 = vmax.xlane.f32.xlu1 %v1544_v13  ;;  %2426 = vmatpush3.bf16.msra.mxu0 %v2637_v49  ;;  %v2644_v13 = vld [vmem:[#allocation9 + $0x58] sm:$0xff]   ;;  %v2654_v49 = vld [vmem:[#allocation9 + $0xe8] sm:$0xff]  }
 0x512   : > { %2466 = vmatpush3.bf16.msra.mxu1 %v2639_v44  ;;  %2427 = vmatprep.subr.bf16.mxu0 %v2640_v39  ;;  %v2652_v44 = vld [vmem:[#allocation9 + $0x68] sm:$0xff]  }
 0x513   : > { %2467 = vmatprep.subr.bf16.mxu1 %v2642_v24  ;;  %v2653_v39 = vld [vmem:[#allocation9 + $0x28] sm:$0xff]  }
 0x514   : > { %v2655_v24 = vld [vmem:[#allocation9 + $0xa8] sm:$0xff]  }
 0x515   : > { %2428 = vmatpush3.bf16.msra.mxu0 %v2641_v14  ;;  %v2656_v14 = vld [vmem:[#allocation9 + $0x70] sm:$0xff]  }
 0x516   : > { %2468 = vmatpush3.bf16.msra.mxu1 %v2643_v58  ;;  %2429 = vmatprep.subr.bf16.mxu0 %v2644_v13  ;;  %v2658_v58 = vld [vmem:[#allocation9 + $0xf0] sm:$0xff]  }
 0x517   : > { %2469 = vmatprep.subr.bf16.mxu1 %v2646_v52  ;;  %v2657_v52 = vld [vmem:[#allocation9 + $0x30] sm:$0xff]  }
 0x519   : > { %2430 = vmatpush3.bf16.msra.mxu0 %v2645_v55 }
 0x51a   : > { %2470 = vmatpush3.bf16.msra.mxu1 %v2647_v43  ;;  %2431 = vmatprep.subr.bf16.mxu0 %v2648_v42 }
 0x51b   : > { %2471 = vmatprep.subr.bf16.mxu1 %v2650_v47 }
 0x51d   : > { %2432 = vmatpush3.bf16.msra.mxu0 %v2649_v11 }
 0x51e   : > { %2472 = vmatpush3.bf16.msra.mxu1 %v2651_v40  ;;  %2433 = vmatprep.subr.bf16.mxu0 %v2652_v44 }
 0x51f   : > { %2473 = vmatprep.subr.bf16.mxu1 %v2654_v49 }
 0x521   : > { %2434 = vmatpush3.bf16.msra.mxu0 %v2653_v39 }
 0x522   : > { %2474 = vmatpush3.bf16.msra.mxu1 %v2655_v24  ;;  %2435 = vmatprep.subr.bf16.mxu0 %v2656_v14 }
 0x523   : > { %2475 = vmatprep.subr.bf16.mxu1 %v2658_v58 }
 0x525   : > { %2436 = vmatpush3.bf16.msra.mxu0 %v2657_v52 }
 0x582   : > { %v1077_v13 = vpop.xlane.xlu0 %1076 }
 0x583   : > { %vm1093_vm0 = vcmp.ge.f32.partialorder %v4011_v1, %v1077_v13  ;;  %vm1094_vm1 = vcmp.ge.f32.partialorder %v4014_v30, %v1077_v13  ;;  %vm1095_vm2 = vcmp.ge.f32.partialorder %v4020_v21, %v1077_v13  ;;  %vm1096_vm3 = vcmp.ge.f32.partialorder %v4033_v48, %v1077_v13 }
 0x584   : > { %v1109_v55 = vsel %vm1093_vm0, -inf, %v4011_v1  ;;  %v1110_v43 = vsel %vm1094_vm1, -inf, %v4014_v30  ;;  %v1111_v11 = vsel %vm1095_vm2, -inf, %v4020_v21  ;;  %v1112_v44 = vsel %vm1096_vm3, -inf, %v4033_v48 }
 0x585   : > { %v1125_v42 = vmax.f32 %v1109_v55, %v1110_v43 }
 0x586   : > { %v1082_v47 = vpop.xlane.xlu1 %1081 }
 0x587   : > { %vm1097_vm4 = vcmp.ge.f32.partialorder %v4027_v45, %v1082_v47  ;;  %vm1098_vm5 = vcmp.ge.f32.partialorder %v4030_v29, %v1082_v47  ;;  %v1126_v40 = vmax.f32 %v1125_v42, %v1111_v11  ;;  %vm1099_vm6 = vcmp.ge.f32.partialorder %v4040_v41, %v1082_v47 }
 0x588   : > { %v1113_v49 = vsel %vm1097_vm4, -inf, %v4027_v45  ;;  %v1114_v1 = vsel %vm1098_vm5, -inf, %v4030_v29  ;;  %vm1100_vm7 = vcmp.ge.f32.partialorder %v4053_v28, %v1082_v47  ;;  %v1115_v21 = vsel %vm1099_vm6, -inf, %v4040_v41 }
 0x589   : > { %v1127_v30 = vmax.f32 %v1126_v40, %v1112_v44  ;;  %v1130_v39 = vmax.f32 %v1113_v49, %v1114_v1  ;;  %v1116_v48 = vsel %vm1100_vm7, -inf, %v4053_v28  ;;  %v2659_v44 = vld [vmem:[#allocation9 + $0xb0] sm:$0xff]   ;;  %v2661_v49 = vld [vmem:[#allocation9 + $0x38] sm:$0xff]  }
 0x58a   : > { %v1087_v24 = vpop.xlane.xlu0 %1086  ;;  %v2662_v1 = vld [vmem:[#allocation9 + $0xf8] sm:$0xff]   ;;  %2476 = vmatpush3.bf16.msra.mxu1 %v2659_v44  ;;  %v4515_v44 = vld [vmem:[#allocation30_spill] sm:$0xff] }
 0x58b   : > { %vm1101_vm8 = vcmp.ge.f32.partialorder %v4047_v51, %v1087_v24  ;;  %vm1102_vm9 = vcmp.ge.f32.partialorder %v4050_v62, %v1087_v24  ;;  %1128 = vmax.xlane.f32.xlu0 %v1127_v30  ;;  %v1131_v14 = vmax.f32 %v1130_v39, %v1115_v21  ;;  %vm1103_vm10 = vcmp.ge.f32.partialorder %v4060_v22, %v1087_v24 }
 0x58c   : > { %v1117_v45 = vsel %vm1101_vm8, -inf, %v4047_v51  ;;  %v1118_v29 = vsel %vm1102_vm9, -inf, %v4050_v62  ;;  %vm1104_vm11 = vcmp.ge.f32.partialorder %v4064_v2, %v1087_v24  ;;  %v1119_v41 = vsel %vm1103_vm10, -inf, %v4060_v22  ;;  %2477 = vmatprep.subr.bf16.mxu1 %v2662_v1  ;;  %v4518_v1 = vld [vmem:[#allocation29_spill] sm:$0xff] }
 0x58d   : > { %v1132_v58 = vmax.f32 %v1131_v14, %v1116_v48  ;;  %v1135_v52 = vmax.f32 %v1117_v45, %v1118_v29  ;;  %v1120_v55 = vsel %vm1104_vm11, -inf, %v4064_v2  ;;  %v2663_v29 = vld [vmem:[#allocation9 + $0xb8] sm:$0xff]  }
 0x58e   : > { %2478 = vmatpush3.bf16.msra.mxu1 %v2663_v29 }
 0x58f   : > { %1133 = vmax.xlane.f32.xlu1 %v1132_v58  ;;  %v1136_v13 = vmax.f32 %v1135_v52, %v1119_v41 }
 0x591   : > { %v1137_v43 = vmax.f32 %v1136_v13, %v1120_v55 }
 0x593   : > { %v1092_v42 = vpop.xlane.xlu1 %1091  ;;  %1138 = vmax.xlane.f32.xlu0 %v1137_v43 }
 0x594   : > { %vm1105_vm12 = vcmp.ge.f32.partialorder %v4071_v33, %v1092_v42  ;;  %vm1106_vm13 = vcmp.ge.f32.partialorder %v4074_v50, %v1092_v42  ;;  %vm1107_vm14 = vcmp.ge.f32.partialorder %v4080_v10, %v1092_v42  ;;  %vm1108_vm15 = vcmp.ge.f32.partialorder %v4087_v8, %v1092_v42 }
 0x595   : > { %v1121_v51 = vsel %vm1105_vm12, -inf, %v4071_v33  ;;  %v1122_v62 = vsel %vm1106_vm13, -inf, %v4074_v50  ;;  %v1123_v22 = vsel %vm1107_vm14, -inf, %v4080_v10  ;;  %v1124_v40 = vsel %vm1108_vm15, -inf, %v4087_v8  ;;  %v2660_v33 = vld [vmem:[#allocation9 + $0x78] sm:$0xff]  }
 0x596   : > { %v1140_v28 = vmax.f32 %v1121_v51, %v1122_v62  ;;  %2437 = vmatprep.subr.bf16.mxu0 %v2660_v33 }
 0x597   : > { %2438 = vmatpush3.bf16.msra.mxu0 %v2661_v49  ;;  %v4516_v49 = vld [vmem:[#allocation28_spill] sm:$0xff] }
 0x598   : > { %v1531_v47 = vpop.xlane.xlu0 %1530  ;;  %v1141_v2 = vmax.f32 %v1140_v28, %v1123_v22  ;;  %v1536_v11 = vpop.xlane.xlu1 %1535 }
 0x599   : > { %vm1547_vm0 = vcmp.ge.f32.partialorder %v4090_v9, %v1531_v47  ;;  %vm1548_vm1 = vcmp.ge.f32.partialorder %v4093_v25, %v1531_v47  ;;  %vm1549_vm2 = vcmp.ge.f32.partialorder %v4109_v61, %v1531_v47  ;;  %vm1551_vm3 = vcmp.ge.f32.partialorder %v4099_v32, %v1536_v11 }
 0x59a   : > { %vm1552_vm4 = vcmp.ge.f32.partialorder %v4102_v54, %v1536_v11  ;;  %v1142_v50 = vmax.f32 %v1141_v2, %v1124_v40  ;;  %v1563_v10 = vsel %vm1547_vm0, -inf, %v4090_v9  ;;  %v1564_v30 = vsel %vm1548_vm1, -inf, %v4093_v25  ;;  %v4514_v40 = vld [vmem:[#allocation27_spill] sm:$0xff] }
 0x59b   : > { %vm1553_vm5 = vcmp.ge.f32.partialorder %v4116_v7, %v1536_v11  ;;  %vm1550_vm6 = vcmp.ge.f32.partialorder %v4119_v35, %v1531_v47  ;;  %v1579_v8 = vmax.f32 %v1563_v10, %v1564_v30  ;;  %v1567_v39 = vsel %vm1551_vm3, -inf, %v4099_v32  ;;  %v4519_v30 = vld [vmem:[#allocation23_spill] sm:$0xff] }
 0x59c   : > { %1143 = vmax.xlane.f32.xlu1 %v1142_v50  ;;  %v1568_v24 = vsel %vm1552_vm4, -inf, %v4102_v54  ;;  %v1565_v9 = vsel %vm1549_vm2, -inf, %v4109_v61  ;;  %vm1554_vm7 = vcmp.ge.f32.partialorder %v4124_v34, %v1536_v11  ;;  %v1569_v14 = vsel %vm1553_vm5, -inf, %v4116_v7  ;;  %v4513_v11 = vld [vmem:[#allocation24_spill] sm:$0xff]  ;;  %v4517_v50 = vld [vmem:[#allocation26_spill] sm:$0xff] }
 0x59d   : > { %v1584_v25 = vmax.f32 %v1567_v39, %v1568_v24  ;;  %v1580_v21 = vmax.f32 %v1579_v8, %v1565_v9  ;;  %v1566_v48 = vsel %vm1550_vm6, -inf, %v4119_v35  ;;  %v1541_v58 = vpop.xlane.xlu0 %1540  ;;  %v1570_v54 = vsel %vm1554_vm7, -inf, %v4124_v34  ;;  %v4520_v39 = vld [vmem:[#allocation25_spill] sm:$0xff]  ;;  %v4300_v9 = vld [vmem:[%s4445_s1] ss:$0 sm:$0xff] }
 0x59e   : > { %vm1555_vm8 = vcmp.ge.f32.partialorder %v4131_v57, %v1541_v58  ;;  %vm1556_vm9 = vcmp.ge.f32.partialorder %v4134_v3, %v1541_v58  ;;  %v1546_v61 = vpop.xlane.xlu1 %1545  ;;  %vm1557_vm12 = vcmp.ge.f32.partialorder %v4149_v6, %v1541_v58  ;;  %vm1558_vm14 = vcmp.ge.f32.partialorder %v4159_v31, %v1541_v58  ;;  %v4307_v58 = vld [vmem:[%s3082_s8 + $0x10] sm:$0xff] }
 0x59f   : > { %v1585_v45 = vmax.f32 %v1584_v25, %v1569_v14  ;;  %v1581_v32 = vmax.f32 %v1580_v21, %v1566_v48  ;;  %vm1559_vm10 = vcmp.ge.f32.partialorder %v4140_v19, %v1546_v61  ;;  %vm1560_vm11 = vcmp.ge.f32.partialorder %v4143_v53, %v1546_v61  ;;  %v2664_v25 = vld [vmem:[%s3082_s8] sm:$0xff]  ;;  %v2665_v14 = vld [vmem:[%s3082_s8 + $0x8] sm:$0xff] }
 0x5a0   : > { %v1571_v7 = vsel %vm1555_vm8, -inf, %v4131_v57  ;;  %v1572_v35 = vsel %vm1556_vm9, -inf, %v4134_v3  ;;  %vm1561_vm13 = vcmp.ge.f32.partialorder %v4156_v18, %v1546_v61  ;;  %v1575_v41 = vsel %vm1559_vm10, -inf, %v4140_v19 }
 0x5a1   : > { %v1586_v52 = vmax.f32 %v1585_v45, %v1570_v54  ;;  %1582 = vmax.xlane.f32.xlu0 %v1581_v32  ;;  %v1589_v34 = vmax.f32 %v1571_v7, %v1572_v35  ;;  %v1576_v13 = vsel %vm1560_vm11, -inf, %v4143_v53  ;;  %v1573_v55 = vsel %vm1557_vm12, -inf, %v4149_v6 }
 0x5a2   : > { %vm1562_vm15 = vcmp.ge.f32.partialorder %v4164_v36, %v1546_v61  ;;  %v1594_v43 = vmax.f32 %v1575_v41, %v1576_v13  ;;  %v1577_v57 = vsel %vm1561_vm13, -inf, %v4156_v18  ;;  %v1574_v51 = vsel %vm1558_vm14, -inf, %v4159_v31  ;;  %v2667_v13 = vld [vmem:[%s3082_s8 + $0x18] sm:$0xff] }
 0x5a3   : > { %1587 = vmax.xlane.f32.xlu1 %v1586_v52  ;;  %v1590_v42 = vmax.f32 %v1589_v34, %v1573_v55  ;;  %v1578_v28 = vsel %vm1562_vm15, -inf, %v4164_v36  ;;  %v2376_v53 = vpack.c.bf16 %v3119_v0, %v3115_v60  ;;  %v2379_v6 = vpack.c.bf16 %v3117_v63, %v3111_v56 }
 0x5a4   : > { %v1595_v3 = vmax.f32 %v1594_v43, %v1577_v57  ;;  %v2400_v18 = vpack.c.bf16 %v3134_v15, %v3123_v4  ;;  %v2403_v31 = vpack.c.bf16 %v3125_v5, %v3113_v59  ;;  %v2394_v33 = vpack.c.bf16 %v4514_v40, %v4513_v11 }
 0x5a5   : > { %v1591_v62 = vmax.f32 %v1590_v42, %v1574_v51  ;;  %v2418_v10 = vpack.c.bf16 %v4515_v44, %v4516_v49  ;;  %v2397_v8 = vpack.c.bf16 %v4517_v50, %v4519_v30  ;;  %v2421_v24 = vpack.c.bf16 %v4518_v1, %v4520_v39 }
 0x5a6   : > { %v1596_v22 = vmax.f32 %v1595_v3, %v1578_v28  ;;  %v2075_v21 = vsub.f32 %v2664_v25, %v4300_v9  ;;  %v2076_v48 = vsub.f32 %v2665_v14, %v4300_v9  ;;  %v2077_v32 = vsub.f32 %v4307_v58, %v4300_v9  ;;  %v4316_v3 = vld [vmem:[%s4446_s2] ss:$0 sm:$0xff] }
 0x5a7   : > { %1592 = vmax.xlane.f32.xlu0 %v1591_v62  ;;  %v2078_v55 = vsub.f32 %v2667_v13, %v4300_v9 }
 0x5a8   : > { %1597 = vmax.xlane.f32.xlu1 %v1596_v22  ;;  %v2104_v45 = vmul.f32 %v2075_v21, %v2075_v21  ;;  %v2105_v29 = vmul.f32 %v2076_v48, %v2076_v48  ;;  %v2106_v43 = vmul.f32 %v2077_v32, %v2077_v32 }
 0x5aa   : > { %v2112_v41 = vadd.f32 %v2105_v29, %v2104_v45 }
 0x618   : > { %v1129_v19 = vpop.xlane.xlu0 %1128 }
 0x619   : > { %vm1145_vm0 = vcmp.ge.f32.partialorder %v3111_v56, %v1129_v19  ;;  %vm1147_vm4 = vcmp.ge.f32.partialorder %v3113_v59, %v1129_v19  ;;  %vm1146_vm8 = vcmp.ge.f32.partialorder %v3115_v60, %v1129_v19  ;;  %vm1148_vm10 = vcmp.ge.f32.partialorder %v3123_v4, %v1129_v19 }
 0x61a   : > { %v2382_v60 = vpack.c.bf16 %v3142_v23, %v3138_v17  ;;  %v2406_v56 = vpack.c.bf16 %v3158_v37, %v3147_v26  ;;  %v2385_v59 = vpack.c.bf16 %v3140_v20, %v3132_v12 }
 0x61c   : > { %v1134_v47 = vpop.xlane.xlu1 %1133 }
 0x61d   : > { %vm1149_vm1 = vcmp.ge.f32.partialorder %v3117_v63, %v1134_v47  ;;  %vm1151_vm2 = vcmp.ge.f32.partialorder %v3125_v5, %v1134_v47  ;;  %vm1150_vm3 = vcmp.ge.f32.partialorder %v3119_v0, %v1134_v47  ;;  %vm1152_vm6 = vcmp.ge.f32.partialorder %v3134_v15, %v1134_v47  ;;  %v4508_v15 = vld [vmem:[#allocation20_spill] sm:$0xff] }
 0x61e   : > { %vm2378_vm5 = vmpackc.low %vm1149_vm1, %vm1145_vm0  ;;  %v2409_v63 = vpack.c.bf16 %v3149_v27, %v3136_v16  ;;  %v2388_v5 = vpack.c.bf16 %v3168_v46, %v3160_v38 }
 0x61f   : > { %vm2402_vm7 = vmpackc.low %vm1151_vm2, %vm1147_vm4 }
 0x620   : > { %vm2375_vm9 = vmpackc.low %vm1150_vm3, %vm1146_vm8  ;;  %v1139_v36 = vpop.xlane.xlu0 %1138 }
 0x621   : > { %2377 = vmatprep.mubr.msk.bf16.mxu0 %vm2375_vm9, %v2376_v53  ;;  %vm2399_vm11 = vmpackc.low %vm1152_vm6, %vm1148_vm10  ;;  %vm1154_vm12 = vcmp.ge.f32.partialorder %v3138_v17, %v1139_v36  ;;  %vm1156_vm1 = vcmp.ge.f32.partialorder %v3147_v26, %v1139_v36  ;;  %vm1153_vm4 = vcmp.ge.f32.partialorder %v3132_v12, %v1139_v36  ;;  %vm1155_vm6 = vcmp.ge.f32.partialorder %v3136_v16, %v1139_v36  ;;  %v4507_v12 = vld [vmem:[#allocation22_spill] sm:$0xff]  ;;  %v4509_v17 = vld [vmem:[#allocation19_spill] sm:$0xff] }
 0x622   : > { %2401 = vmatprep.mubr.msk.bf16.mxu1 %vm2399_vm11, %v2400_v18  ;;  %2380 = vmatmul.mubr.msk.bf16.vlgmr.msra.gmra.mrb[16].mxu0 %vm2378_vm5, %v2379_v6  ;;  %v2412_v16 = vpack.c.bf16 %v4507_v12, %v4508_v15  ;;  %v2107_v6 = vmul.f32 %v2078_v55, %v2078_v55  ;;  %v2113_v18 = vadd.f32 %v2112_v41, %v2106_v43 }
 0x623   : > { %2404 = vmatmul.mubr.msk.bf16.vlgmr.msra.gmra.mrb[16].mxu1 %vm2402_vm7, %v2403_v31  ;;  %v4321_v31 = vld [vmem:[%s3082_s8 + $0x20] sm:$0xff] }
 0x624   : > { %v2079_v36 = vsub.f32 %v4321_v31, %v4300_v9 }
 0x629   : > { %v1144_v2 = vpop.xlane.xlu1 %1143 }
 0x62a   : > { %vm1158_vm13 = vcmp.ge.f32.partialorder %v3142_v23, %v1144_v2  ;;  %vm1160_vm14 = vcmp.ge.f32.partialorder %v3158_v37, %v1144_v2  ;;  %vm1157_vm15 = vcmp.ge.f32.partialorder %v3140_v20, %v1144_v2  ;;  %vm1159_vm2 = vcmp.ge.f32.partialorder %v3149_v27, %v1144_v2  ;;  %v4510_v20 = vld [vmem:[#allocation21_spill] sm:$0xff]  ;;  %v4512_v27 = vld [vmem:[#allocation18_spill] sm:$0xff] }
 0x62b   : > { %vm2381_vm0 = vmpackc.low %vm1158_vm13, %vm1154_vm12  ;;  %v4511_v23 = vld [vmem:[#allocation17_spill] sm:$0xff]  ;;  %v2415_v37 = vpack.c.bf16 %v4510_v20, %v4512_v27 }
 0x62c   : > { %2383 = vmatprep.mubr.msk.bf16.mxu0 %vm2381_vm0, %v2382_v60  ;;  %vm2405_vm3 = vmpackc.low %vm1160_vm14, %vm1156_vm1  ;;  %v2391_v26 = vpack.c.bf16 %v4509_v17, %v4511_v23 }
 0x62d   : > { %2407 = vmatprep.mubr.msk.bf16.mxu1 %vm2405_vm3, %v2406_v56  ;;  %vm2384_vm5 = vmpackc.low %vm1157_vm15, %vm1153_vm4 }
 0x62e   : > { %2386 = vmatmul.mubr.msk.bf16.gmra.mrb[20].mxu0 %vm2384_vm5, %v2385_v59  ;;  %vm2408_vm7 = vmpackc.low %vm1159_vm2, %vm1155_vm6  ;;  %v1583_v0 = vpop.xlane.xlu0 %1582  ;;  %v2114_v59 = vadd.f32 %v2113_v18, %v2107_v6 }
 0x62f   : > { %2410 = vmatmul.mubr.msk.bf16.gmra.mrb[20].mxu1 %vm2408_vm7, %v2409_v63  ;;  %vm1600_vm8 = vcmp.ge.f32.partialorder %v3160_v38, %v1583_v0  ;;  %vm1602_vm12 = vcmp.ge.f32.partialorder %v4508_v15, %v1583_v0  ;;  %vm1599_vm0 = vcmp.ge.f32.partialorder %v4511_v23, %v1583_v0  ;;  %vm1601_vm2 = vcmp.ge.f32.partialorder %v4512_v27, %v1583_v0  ;;  %v4332_v63 = vld [vmem:[%s3082_s8 + $0x28] sm:$0xff] }
 0x630   : > { %v1588_v4 = vpop.xlane.xlu1 %1587  ;;  %v2080_v0 = vsub.f32 %v4332_v63, %v4300_v9 }
 0x631   : > { %vm1604_vm9 = vcmp.ge.f32.partialorder %v3168_v46, %v1588_v4  ;;  %vm1606_vm10 = vcmp.ge.f32.partialorder %v4507_v12, %v1588_v4  ;;  %vm1603_vm13 = vcmp.ge.f32.partialorder %v4509_v17, %v1588_v4  ;;  %vm1605_vm15 = vcmp.ge.f32.partialorder %v4510_v20, %v1588_v4 }
 0x632   : > { %vm2387_vm11 = vmpackc.low %vm1604_vm9, %vm1600_vm8  ;;  %v2108_v4 = vmul.f32 %v2079_v36, %v2079_v36 }
 0x633   : > { %2389 = vmatprep.mubr.msk.bf16.mxu0 %vm2387_vm11, %v2388_v5  ;;  %vm2411_vm14 = vmpackc.low %vm1606_vm10, %vm1602_vm12 }
 0x634   : > { %2413 = vmatprep.mubr.msk.bf16.mxu1 %vm2411_vm14, %v2412_v16  ;;  %vm2390_vm1 = vmpackc.low %vm1603_vm13, %vm1599_vm0  ;;  %v1593_v38 = vpop.xlane.xlu0 %1592 }
 0x635   : > { %vm2414_vm3 = vmpackc.low %vm1605_vm15, %vm1601_vm2  ;;  %v1598_v46 = vpop.xlane.xlu1 %1597  ;;  %vm1608_vm4 = vcmp.ge.f32.partialorder %v4513_v11, %v1593_v38  ;;  %vm1610_vm7 = vcmp.ge.f32.partialorder %v4516_v49, %v1593_v38  ;;  %vm1607_vm12 = vcmp.ge.f32.partialorder %v4519_v30, %v1593_v38  ;;  %vm1609_vm13 = vcmp.ge.f32.partialorder %v4520_v39, %v1593_v38 }
 0x636   : > { %2392 = vmatmul.mubr.msk.bf16.gmra.mrb[24].mxu0 %vm2390_vm1, %v2391_v26  ;;  %vm1612_vm5 = vcmp.ge.f32.partialorder %v4514_v40, %v1598_v46  ;;  %vm1614_vm6 = vcmp.ge.f32.partialorder %v4515_v44, %v1598_v46  ;;  %vm1611_vm8 = vcmp.ge.f32.partialorder %v4517_v50, %v1598_v46  ;;  %vm1613_vm10 = vcmp.ge.f32.partialorder %v4518_v1, %v1598_v46  ;;  %v4337_v46 = vld [vmem:[%s3082_s8 + $0x30] sm:$0xff] }
 0x637   : > { %2416 = vmatmul.mubr.msk.bf16.gmra.mrb[24].mxu1 %vm2414_vm3, %v2415_v37  ;;  %vm2393_vm9 = vmpackc.low %vm1612_vm5, %vm1608_vm4  ;;  %v2109_v37 = vmul.f32 %v2080_v0, %v2080_v0  ;;  %v2115_v38 = vadd.f32 %v2114_v59, %v2108_v4  ;;  %v2081_v11 = vsub.f32 %v4337_v46, %v4300_v9 }
 0x638   : > { %2395 = vmatprep.mubr.msk.bf16.mxu0 %vm2393_vm9, %v2394_v33  ;;  %vm2417_vm11 = vmpackc.low %vm1614_vm6, %vm1610_vm7 }
 0x639   : > { %2419 = vmatprep.mubr.msk.bf16.mxu1 %vm2417_vm11, %v2418_v10  ;;  %vm2396_vm14 = vmpackc.low %vm1611_vm8, %vm1607_vm12  ;;  %v2116_v39 = vadd.f32 %v2115_v38, %v2109_v37  ;;  %v2110_v21 = vmul.f32 %v2081_v11, %v2081_v11 }
 0x63a   : > { %vm2420_vm15 = vmpackc.low %vm1613_vm10, %vm1609_vm13 }
 0x63b   : > { %v2117_v41 = vadd.f32 %v2116_v39, %v2110_v21 }
 0x63e   : > { %2398 = vmatmul.mubr.msk.bf16.gmra.mrb[28].mxu0 %vm2396_vm14, %v2397_v8 }
 0x63f   : > { %2422 = vmatmul.mubr.msk.bf16.gmra.mrb[28].mxu1 %vm2420_vm15, %v2421_v24  ;;  %v4344_v24 = vld [vmem:[%s3082_s8 + $0x38] sm:$0xff]  ;;  %s2759_s8 = scalar_lea.vmem %s4360_s7, 1024 }
 0x640   : > { %p2760_p1 = scmp.ne.s32.totalorder %s4360_s7, %s2759_s8  ;;  %p2767_p13 = scmp.lt.s32.totalorder %s2765_s16, %s2759_s8 }
 0x642   : > { %p2761_p2 = pnand %p2760_p1, %p3027_p6  ;;  %p2768_p3 = por %p2767_p13, %p2766_p8 }
 0x644   : > { %p2762_p4 = pneg %p2761_p2 }
 0x646   : > { %p2769_p7 = pnand %p2768_p3, %p2762_p4 }
 0x6f5   : > { %v2439_v54 = vpop.f32.mrb[16].mxu0 }
 0x6f6   : > { %v2479_v61 = vpop.f32.mrb[16].mxu1  ;;  %v2440_v52 = vpop.f32.mrb[17].mxu0 }
 0x6f7   : > { %v2441_v7 = vadd.f32 %v2440_v52, %v2439_v54  ;;  %v2480_v35 = vpop.f32.mrb[17].mxu1  ;;  %v2442_v34 = vpop.f32.mrb[18].mxu0 }
 0x6f8   : > { %v2481_v42 = vadd.f32 %v2480_v35, %v2479_v61  ;;  %v2482_v57 = vpop.f32.mrb[18].mxu1  ;;  %v2443_v51 = vpop.f32.mrb[19].mxu0 }
 0x6f9   : > { %v1957_v62 = vadd.f32 %v4316_v3, %v2441_v7  ;;  %v2444_v28 = vadd.f32 %v2443_v51, %v2442_v34  ;;  %v2483_v22 = vpop.f32.mrb[19].mxu1 }
 0x6fa   : > { %v2484_v19 = vadd.f32 %v2483_v22, %v2482_v57 }
 0x6fb   : > { %v2022_v47 = vadd.f32 %v2481_v42, %v1957_v62  ;;  %v1960_v53 = vadd.f32 %v4316_v3, %v2444_v28 }
 0x6fd   : > { %2052 = vst [vmem:[%s4327_s15] sm:$0xff] %v2022_v47  ;;  %v2060_v2 = vsub.f32 %v2022_v47, %v2664_v25  ;;  %v2025_v60 = vadd.f32 %v2484_v19, %v1960_v53  ;;  %v2082_v25 = vsub.f32 %v4344_v24, %v4300_v9 }
 0x6ff   : > { %2053 = vst [vmem:[%s4327_s15 + $0x8] sm:$0xff] %v2025_v60  ;;  %v2061_v56 = vsub.f32 %v2025_v60, %v2665_v14  ;;  %v2083_v5 = vmul.f32 %v2060_v2, %v2060_v2  ;;  %v2111_v34 = vmul.f32 %v2082_v25, %v2082_v25 }
 0x701   : > { %v2084_v12 = vmul.f32 %v2061_v56, %v2061_v56  ;;  %v2445_v15 = vpop.f32.mrb[20].mxu0  ;;  %v2118_v47 = vadd.f32 %v2117_v41, %v2111_v34 }
 0x702   : > { %v2485_v16 = vpop.f32.mrb[20].mxu1  ;;  %v2446_v17 = vpop.f32.mrb[21].mxu0 }
 0x703   : > { %v2091_v20 = vadd.f32 %v2084_v12, %v2083_v5  ;;  %v2447_v23 = vadd.f32 %v2446_v17, %v2445_v15  ;;  %v2486_v26 = vpop.f32.mrb[21].mxu1  ;;  %v2448_v27 = vpop.f32.mrb[22].mxu0  ;;  %v2119_v5 = vrot.slane %v2118_v47, 4 }
 0x704   : > { %v2487_v40 = vadd.f32 %v2486_v26, %v2485_v16  ;;  %v2488_v44 = vpop.f32.mrb[22].mxu1  ;;  %v2449_v33 = vpop.f32.mrb[23].mxu0 }
 0x705   : > { %v1965_v49 = vadd.f32 %v4316_v3, %v2447_v23  ;;  %v2450_v50 = vadd.f32 %v2449_v33, %v2448_v27  ;;  %v2489_v10 = vpop.f32.mrb[23].mxu1  ;;  %v2120_v11 = vadd.f32 %v2119_v5, %v2118_v47 }
 0x706   : > { %v2490_v1 = vadd.f32 %v2489_v10, %v2488_v44 }
 0x707   : > { %v2030_v30 = vadd.f32 %v2487_v40, %v1965_v49  ;;  %v1968_v8 = vadd.f32 %v4316_v3, %v2450_v50 }
 0x709   : > { %2054 = vst [vmem:[%s4327_s15 + $0x10] sm:$0xff] %v2030_v30  ;;  %v2062_v14 = vsub.f32 %v2030_v30, %v4307_v58  ;;  %v2033_v48 = vadd.f32 %v2490_v1, %v1968_v8  ;;  %v2451_v45 = vpop.f32.mrb[24].mxu0 }
 0x70a   : > { %v2491_v29 = vpop.f32.mrb[24].mxu1  ;;  %v2452_v32 = vpop.f32.mrb[25].mxu0 }
 0x70b   : > { %v2085_v54 = vmul.f32 %v2062_v14, %v2062_v14  ;;  %2055 = vst [vmem:[%s4327_s15 + $0x18] sm:$0xff] %v2033_v48  ;;  %v2063_v61 = vsub.f32 %v2033_v48, %v2667_v13  ;;  %v2453_v52 = vadd.f32 %v2452_v32, %v2451_v45  ;;  %v2492_v7 = vpop.f32.mrb[25].mxu1  ;;  %v2454_v35 = vpop.f32.mrb[26].mxu0 }
 0x70c   : > { %v2493_v55 = vadd.f32 %v2492_v7, %v2491_v29  ;;  %v2494_v43 = vpop.f32.mrb[26].mxu1  ;;  %v2455_v9 = vpop.f32.mrb[27].mxu0 }
 0x70d   : > { %v2092_v42 = vadd.f32 %v2091_v20, %v2085_v54  ;;  %v2086_v57 = vmul.f32 %v2063_v61, %v2063_v61  ;;  %v1973_v58 = vadd.f32 %v4316_v3, %v2453_v52  ;;  %v2456_v51 = vadd.f32 %v2455_v9, %v2454_v35  ;;  %v2495_v62 = vpop.f32.mrb[27].mxu1 }
 0x70e   : > { %v2496_v28 = vadd.f32 %v2495_v62, %v2494_v43 }
 0x70f   : > { %v2093_v22 = vadd.f32 %v2092_v42, %v2086_v57  ;;  %v2038_v19 = vadd.f32 %v2493_v55, %v1973_v58  ;;  %v1976_v13 = vadd.f32 %v4316_v3, %v2456_v51 }
 0x711   : > { %2056 = vst [vmem:[%s4327_s15 + $0x20] sm:$0xff] %v2038_v19  ;;  %v2064_v53 = vsub.f32 %v2038_v19, %v4321_v31  ;;  %v2041_v6 = vadd.f32 %v2496_v28, %v1976_v13  ;;  %v2457_v18 = vpop.f32.mrb[28].mxu0 }
 0x712   : > { %v2497_v36 = vpop.f32.mrb[28].mxu1  ;;  %v2458_v2 = vpop.f32.mrb[29].mxu0 }
 0x713   : > { %v2087_v60 = vmul.f32 %v2064_v53, %v2064_v53  ;;  %2057 = vst [vmem:[%s4327_s15 + $0x28] sm:$0xff] %v2041_v6  ;;  %v2065_v56 = vsub.f32 %v2041_v6, %v4332_v63  ;;  %v2459_v59 = vadd.f32 %v2458_v2, %v2457_v18  ;;  %v2498_v0 = vpop.f32.mrb[29].mxu1  ;;  %v2460_v4 = vpop.f32.mrb[30].mxu0 }
 0x714   : > { %v2499_v12 = vadd.f32 %v2498_v0, %v2497_v36  ;;  %v2500_v15 = vpop.f32.mrb[30].mxu1  ;;  %v2461_v16 = vpop.f32.mrb[31].mxu0 }
 0x715   : > { %v2094_v17 = vadd.f32 %v2093_v22, %v2087_v60  ;;  %v2088_v31 = vmul.f32 %v2065_v56, %v2065_v56  ;;  %v1981_v20 = vadd.f32 %v4316_v3, %v2459_v59  ;;  %v2462_v23 = vadd.f32 %v2461_v16, %v2460_v4  ;;  %v2501_v26 = vpop.f32.mrb[31].mxu1 }
 0x716   : > { %v2502_v27 = vadd.f32 %v2501_v26, %v2500_v15 }
 0x717   : > { %v2095_v63 = vadd.f32 %v2094_v17, %v2088_v31  ;;  %v2046_v37 = vadd.f32 %v2499_v12, %v1981_v20  ;;  %v1984_v38 = vadd.f32 %v4316_v3, %v2462_v23 }
 0x719   : > { %2058 = vst [vmem:[%s4327_s15 + $0x30] sm:$0xff] %v2046_v37  ;;  %v2066_v40 = vsub.f32 %v2046_v37, %v4337_v46  ;;  %v2049_v44 = vadd.f32 %v2502_v27, %v1984_v38 }
 0x71b   : > { %v2089_v33 = vmul.f32 %v2066_v40, %v2066_v40  ;;  %2059 = vst [vmem:[%s4327_s15 + $0x38] sm:$0xff] %v2049_v44  ;;  %v2067_v49 = vsub.f32 %v2049_v44, %v4344_v24 }
 0x71c   : > { %2772 = shalt.err (!%p2769_p7)
}
 0x71d   : > { %s2773_s17 = scalar_lea.hbm %s4366_s10, 1024  ;;  %s2777_s15 = scalar_lea.hbm %s4449_s5, 4096 }
 0x71e   : > { %p2774_p9 = scmp.ne.s32.totalorder %s4366_s10, %s2773_s17  ;;  %p2778_p5 = scmp.lt.u32.totalorder %s4366_s10, %s4449_s5 }
 0x71f   : > { %p2779_p10 = scmp.lt.u32.totalorder %s2777_s15, %s2773_s17  ;;  %p2781_p1 = scmp.lt.u32.totalorder %s2773_s17, %s4366_s10 }
 0x720   : > { %p2775_p12 = pnand %p2774_p9, %p3027_p6 }
 0x721   : > { %p2780_p11 = por %p2779_p10, %p2778_p5 }
 0x722   : > { %p2776_p0 = pneg %p2775_p12 }
 0x723   : > { %p2782_p2 = por %p2781_p1, %p2780_p11 }
 0x725   : > { %p2783_p4 = pnand %p2782_p2, %p2776_p0 }
 0x727   : > { %2786 = shalt.err (!%p2783_p4)
}
 0x728   : > { %s2874_s9 = smov 128   ;;  %s2875_s8 = smov 8   ;;  %v2096_v3 = vadd.f32 %v2095_v63, %v2089_v33  ;;  %v2090_v46 = vmul.f32 %v2067_v49, %v2067_v49  ;;  %v2121_v50 = vrot.slane %v2120_v11, 2  ;;  %vm2125_vm0 = vcmask 1040384  }
 0x729   : > { %2513 = dma.vmem_to_hbm [thread:$0]  (%p3027_p6), %s4360_s7, 1024, %s4366_s10, %s2129_s14, %s2874_s9, %s2874_s9, %s2875_s8  }
 0x72a   : > { %v2097_v10 = vadd.f32 %v2096_v3, %v2090_v46  ;;  %v2122_v30 = vadd.f32 %v2121_v50, %v2120_v11  ;;  %s2299_s27 = sshll.u32 %s3076_s13, 1  ;;  %s2370_s29 = sshll.u32 %s2933_s25, 5 }
 0x72b   : > { %s309_s16 = scalar_lea.vmem [#allocation11], %s2299_s27  ;;  %s4401_s14 = scalar_lea.hbm %s4450_s6, %s2370_s29 }
 0x72c   : > { %v2098_v1 = vrot.slane %v2097_v10, 4  ;;  %v2123_v24 = vrot.slane %v2122_v30, 1  ;;  %s2163_s17 = sshll.u32 %s309_s16, 4  ;;  %s2134_s18 = scalar_lea.sflag [#allocation12], %s3076_s13  ;;  %s4403_s17 = int_to_ptr.vmem [resolvable:$true] %s2163_s17 }
 0x72d   : > { %s2787_s19 = scalar_lea.vmem %s4403_s17, 32  ;;  %s2876_s25 = smov [#allocation11]  }
 0x72e   : > { %v2099_v8 = vadd.f32 %v2098_v1, %v2097_v10  ;;  %v2124_v14 = vadd.f32 %v2123_v24, %v2122_v30  ;;  %p2788_p8 = scmp.ne.s32.totalorder %s4403_s17, %s2787_s19  ;;  %s2791_s15 = sshll.u32 %s2876_s25, 4  ;;  %s2792_s15 = int_to_ptr.vmem [resolvable:$false] %s2791_s15 }
 0x72f   : > { %s2793_s30 = scalar_lea.vmem %s2792_s15, 64  ;;  %p2794_p7 = scmp.lt.s32.totalorder %s4403_s17, %s2792_s15 }
 0x730   : > { %v2100_v39 = vrot.slane %v2099_v8, 2  ;;  %p2789_p13 = pnand %p2788_p8, %p3027_p6  ;;  %p2795_p9 = scmp.lt.s32.totalorder %s2793_s30, %s2787_s19 }
 0x732   : > { %v2101_v25 = vadd.f32 %v2100_v39, %v2099_v8  ;;  %p2790_p3 = pneg %p2789_p13  ;;  %p2796_p12 = por %p2795_p9, %p2794_p7 }
 0x734   : > { %v2102_v21 = vrot.slane %v2101_v25, 1  ;;  %p2797_p0 = pnand %p2796_p12, %p2790_p3 }
 0x736   : > { %v2103_v48 = vadd.f32 %v2102_v21, %v2101_v25 }
 0x738   : > { %v2126_v45 = vsel %vm2125_vm0, %v2103_v48, %v2124_v14 }
 0x739   : > { %2127 = vst [vmem:[%s309_s16] sm:$0x3] %v2126_v45 }
 0x73a   : > { %2800 = shalt.err (!%p2797_p0)
}
 0x73b   : > { %s2801_s13 = scalar_lea.hbm %s4401_s14, 32  ;;  %s2805_s8 = scalar_lea.hbm %s4450_s6, 128 }
 0x73c   : > { %p2802_p5 = scmp.ne.s32.totalorder %s4401_s14, %s2801_s13  ;;  %p2806_p1 = scmp.lt.u32.totalorder %s4401_s14, %s4450_s6 }
 0x73d   : > { %p2807_p2 = scmp.lt.u32.totalorder %s2805_s8, %s2801_s13  ;;  %p2809_p8 = scmp.lt.u32.totalorder %s2801_s13, %s4401_s14 }
 0x73e   : > { %p2803_p10 = pnand %p2802_p5, %p3027_p6 }
 0x73f   : > { %p2808_p4 = por %p2807_p2, %p2806_p1 }
 0x740   : > { %p2804_p11 = pneg %p2803_p10 }
 0x741   : > { %p2810_p13 = por %p2809_p8, %p2808_p4 }
 0x743   : > { %p2811_p3 = pnand %p2810_p13, %p2804_p11 }
 0x745   : > { %2814 = shalt.err (!%p2811_p3)
}
 0x746   : > { %2514 = dma.vmem_to_hbm [thread:$0]  (%p3027_p6), %s4403_s17, 32, %s4401_s14, %s2134_s18  }
 0x747 PF: > { %p2540_p7 = scmp.ge.s32.totalorder %s2861_s24, 2  ;;  %s2175_s16 = sand.u32 1, %s2849_s21  }
 0x748   : > { %p4521_p9 = scmp.ne.s32.totalorder %s4483_s28, 0  ;;  %s2176_s7 = scalar_lea.sflag [#allocation6], %s2175_s16 }
 0x74a   : > { %p2529_p12 = pnand %p2540_p7, %p4521_p9 }
 0x74c   : > { %2840 = dma.done.wait (!%p2529_p12), %s2176_s7, 1024  }
 0x74d   : > { %2842 = vsyncadd (!%p2529_p12), %s2176_s7, 4294966272  ;;  %s2185_s10 = scalar_lea.sflag [#allocation12], %s2175_s16 }
 0x74e   : > { %2844 = dma.done.wait (!%p2529_p12), %s2185_s10, 32  }
 0x74f   : > { %2846 = vsyncadd (!%p2529_p12), %s2185_s10, 4294967264  ;;  %p24_p6 = scmp.ge.s32.totalorder %s3014_s26, 6   ;;  %s4522_s21 = smov %s2853_s22 }
 0x750   : > { %s4523_s22 = smov %s2857_s23  ;;  %s4524_s23 = smov %s3023_s11 }
 0x751   : > { %s4525_s24 = smov %s3014_s26  ;;  %26 = sbr.rel (!%p24_p6) target bundleno = 8 (0x8), region = 114 }
 0x758   :  { %2190 = vsyncpa [#allocation5], 1 }
 0x759   :  { %2192 = vsyncpa [#allocation5 + $0x1], 1 }
 0x75a   :  { %2193 = vsyncpa [#allocation8], 1 }
 0x75b   :  { %2194 = vsyncpa [#allocation6], 1 }
 0x75c   :  { %2196 = vsyncpa [#allocation6 + $0x1], 1 }
 0x75d   :  { %2197 = vsyncpa [#allocation12], 1 }
 0x75e   :  { %2199 = vsyncpa [#allocation12 + $0x1], 1 }

</bundles_post_ra>
